<compile_context>
chip_gen: v5e
topology: v5e:2x2
jax: 0.10.0
libtpu: 0.0.40
codegen_flags: <defaults>
</compile_context>

<pallas_src>
import jax
import jax.numpy as jnp
from jax import lax
from jax.experimental import pallas as pl
from jax.experimental.pallas import tpu as pltpu


def _lane_concat(pieces):
    """Concatenate along the last (lane) axis using only 2-operand concats."""
    pieces = list(pieces)
    while len(pieces) > 1:
        nxt = []
        for i in range(0, len(pieces) - 1, 2):
            nxt.append(jnp.concatenate([pieces[i], pieces[i + 1]], axis=-1))
        if len(pieces) % 2:
            nxt.append(pieces[-1])
        pieces = nxt
    return pieces[0]


def _make_split_conv_kernel(*, th, W, cg_in, cg_out, split_groups, lane_dense_out):
    """Kernel factory; all shape parameters are static (closed over)."""
    cin = 2 * cg_in
    cout = 2 * cg_out

    def dx_im2col(rows):
        # rows: (th, W+2, C) -> (th*W, 3*C); K index = dx*C + c (matches the
        # wrapper's weight reshape). Width slices are cheap sublane offsets;
        # the reshape only merges the two leading dims (minor dim unchanged).
        cat = _lane_concat([rows[:, dx:dx + W, :] for dx in range(3)])
        return cat.reshape(th * W, 3 * rows.shape[-1])

    def kernel(x_ref, w_ref, b_ref, o_ref):
        # x_ref: (th+2, W+2, Cin)   overlapped input rows (one contiguous DMA)
        # w_ref: (3, 3*Cin, Cout)   fused, or (2, 3, 3*Cg_in, Cg_out) split
        # b_ref: (1, Cout)          f32 biases (conv1 ++ conv2)
        # o_ref: (th, W*Cout)       lane-dense, or (th*W, Cout) fallback
        slab = x_ref[...]
        wts = w_ref[...]
        bias = b_ref[...]

        if not split_groups:
            # Both groups fused into one block-diagonal matmul per dy tap
            # (only used while 2*Cg fits a single MXU tile).
            acc = jnp.zeros((th * W, cout), jnp.float32)
            for dy in range(3):
                acc = acc + jnp.dot(dx_im2col(slab[dy:dy + th]), wts[dy],
                                    preferred_element_type=jnp.float32)
            acc = acc + bias
        else:
            # Per-group matmuls writing disjoint Cout halves: no zero-MAC waste
            # once the group size exceeds the MXU tile.
            halves = []
            for g in range(2):
                acc_g = jnp.zeros((th * W, cg_out), jnp.float32)
                for dy in range(3):
                    rows_g = slab[dy:dy + th, :, g * cg_in:(g + 1) * cg_in]
                    acc_g = acc_g + jnp.dot(dx_im2col(rows_g), wts[g, dy],
                                            preferred_element_type=jnp.float32)
                halves.append(acc_g + bias[:, g * cg_out:(g + 1) * cg_out])
            acc = jnp.concatenate(halves, axis=-1)

        if lane_dense_out:
            # Assemble the lane-dense (th, W*Cout) row value in registers
            # (XLU-side shuffles), then issue one dense store / fat DMA.
            acc3 = acc.reshape(th, W, cout)          # split of major dims only
            dense = _lane_concat([acc3[:, x, :] for x in range(W)])
            o_ref[...] = dense.astype(o_ref.dtype)
        else:
            o_ref[...] = acc.astype(o_ref.dtype)

    return kernel


def _pick_tile_h(H, W, cin, cout, n_batch, comp_bytes, out_bytes):
    """Row-tile height: big enough to amortize per-step overhead, small enough
    to stay well under v7x's 32 MiB scoped VMEM, and >=2 grid steps total."""
    Wp = W + 2
    per_row = (2 * Wp * cin * comp_bytes          # double-buffered input block
               + 2 * W * 3 * cin * comp_bytes     # dx-im2col transients
               + 3 * W * cout * 4                 # f32 matmul out + accumulator
               + 3 * W * cout * out_bytes)        # double-buffered output block
    budget = 20 * 1024 * 1024                     # headroom under 32 MiB scoped
    rows_vmem = max(8, budget // max(per_row, 1))
    rows_target = max(8, 16384 // max(W, 1))      # ~8-16K positions per block
    th = min(rows_vmem, rows_target)
    th = max(8, (th // 8) * 8)
    th = min(th, -(-H // 8) * 8)
    # Megacore (v7x): keep at least 2 grid steps so both TensorCores get work.
    while n_batch * (-(-H // th)) < 2 and th > 8:
        th = max(8, ((th // 2 + 7) // 8) * 8)
    return th


def split_dilation_forward_nhwc(x_nhwc, w1, b1, w2, b2, *, tile_h=None,
                                compute_dtype=jnp.bfloat16,
                                out_dtype=jnp.float32,
                                force_split_groups=None,
                                vmem_limit_bytes=32 * 1024 * 1024):
    """Fused Split_Dilation forward on NHWC activations (the fast path)."""
    N, H, W, Cin = x_nhwc.shape
    Cg_out, Cg_in, kh, kw = w1.shape
    assert (kh, kw) == (3, 3) and w2.shape == w1.shape
    assert Cin == 2 * Cg_in, "Split_Dilation (spl=2) expects in_ch == 2*(in_ch//2)"
    Cout = 2 * Cg_out
    Wp = W + 2

    comp_bytes = jnp.dtype(compute_dtype).itemsize
    out_bytes = jnp.dtype(out_dtype).itemsize
    if tile_h is None:
        th = _pick_tile_h(H, W, Cin, Cout, N, comp_bytes, out_bytes)
    else:
        th = max(8, (int(tile_h) // 8) * 8)
        th = min(th, -(-H // 8) * 8)
    num_t = -(-H // th)
    Hpad = num_t * th

    # Keep the block-diagonal two-group fusion only while 2*Cg fits one MXU
    # tile (128 on v5e, 256 on v6e/v7x); beyond that split per group.
    split_groups = (Cout > 128) if force_split_groups is None else bool(force_split_groups)
    # Lane-dense output layout whenever Cout alone would be lane-sparse.
    lane_dense_out = (Cout < 128) and (W <= 512)

    # --- input: pad once (1px border + bottom fill) and lay out overlapped
    # row tiles so every grid step is one contiguous (th+2, Wp, Cin) DMA.
    xc = x_nhwc.astype(compute_dtype)
    xp = jnp.pad(xc, ((0, 0), (1, Hpad + 1 - H), (1, 1), (0, 0)))
    if num_t == 1:
        xov = xp[:, None]                                    # (N, 1, th+2, Wp, Cin)
    else:
        row_idx = jnp.arange(num_t)[:, None] * th + jnp.arange(th + 2)[None, :]
        xov = xp[:, row_idx]                                 # (N, num_t, th+2, Wp, Cin)

    # --- weights: fold the 3 dx taps into the contraction (K = 3*Cin per dy).
    w1_t = jnp.transpose(w1, (2, 3, 1, 0))                   # (3, 3, Cg_in, Cg_out)
    w2_t = jnp.transpose(w2, (2, 3, 1, 0))
    if split_groups:
        wk = jnp.stack([w1_t.reshape(3, 3 * Cg_in, Cg_out),
                        w2_t.reshape(3, 3 * Cg_in, Cg_out)]).astype(compute_dtype)
        w_spec = pl.BlockSpec((2, 3, 3 * Cg_in, Cg_out), lambda n, t: (0, 0, 0, 0))
    else:
        wt = jnp.zeros((3, 3, Cin, Cout), jnp.float32)
        wt = wt.at[:, :, :Cg_in, :Cg_out].set(w1_t)
        wt = wt.at[:, :, Cg_in:, Cg_out:].set(w2_t)
        wk = wt.reshape(3, 3 * Cin, Cout).astype(compute_dtype)
        w_spec = pl.BlockSpec((3, 3 * Cin, Cout), lambda n, t: (0, 0, 0))
    bias = jnp.concatenate([b1, b2]).reshape(1, Cout).astype(jnp.float32)

    kernel = _make_split_conv_kernel(th=th, W=W, cg_in=Cg_in, cg_out=Cg_out,
                                     split_groups=split_groups,
                                     lane_dense_out=lane_dense_out)

    if lane_dense_out:
        out_shape = jax.ShapeDtypeStruct((N, Hpad, W * Cout), out_dtype)
        out_spec = pl.BlockSpec((None, th, W * Cout), lambda n, t: (n, t, 0))
    else:
        out_shape = jax.ShapeDtypeStruct((N, Hpad * W, Cout), out_dtype)
        out_spec = pl.BlockSpec((None, th * W, Cout), lambda n, t: (n, t, 0))

    y = pl.pallas_call(
        kernel,
        out_shape=out_shape,
        grid=(N, num_t),
        in_specs=[
            pl.BlockSpec((None, None, th + 2, Wp, Cin), lambda n, t: (n, t, 0, 0, 0)),
            w_spec,
            pl.BlockSpec((1, Cout), lambda n, t: (0, 0)),
        ],
        out_specs=out_spec,
        compiler_params=pltpu.CompilerParams(
            dimension_semantics=("parallel", "parallel"),
            vmem_limit_bytes=vmem_limit_bytes),
    )(xov, wk, bias)

    # Rows H..Hpad come from zero padding (and carry leaked bias); they are
    # sliced off here -- never turn this slice into a reduction over them.
    y = y.reshape(N, Hpad, W, Cout)[:, :H]
    return y


def split_dilation_forward(x_nchw, w1, b1, w2, b2, **kwargs):
    """NCHW compatibility wrapper (matches the PyTorch module's layout).

    If activations already live in NHWC, call split_dilation_forward_nhwc
    directly and skip these two layout transposes (~2 extra HBM passes).
    """
    x_nhwc = jnp.transpose(x_nchw, (0, 2, 3, 1))
    y = split_dilation_forward_nhwc(x_nhwc, w1, b1, w2, b2, **kwargs)
    return jnp.transpose(y, (0, 3, 1, 2))


def ref_split_dilation(x, w1, b1, w2, b2):
    """Plain-JAX reference matching the PyTorch Split_Dilation forward."""
    cg = w1.shape[1]
    x0, x1 = x[:, :cg], x[:, cg:2 * cg]

    def conv(xg, w, b):
        y = lax.conv_general_dilated(
            xg, w, window_strides=(1, 1), padding=((1, 1), (1, 1)),
            dimension_numbers=("NCHW", "OIHW", "NCHW"))
        return y + b[None, :, None, None]

    return jnp.concatenate([conv(x0, w1, b1), conv(x1, w2, b2)], axis=1)


if __name__ == "__main__":
    N, CH, H, W = 2, 8, 16, 16          # in_ch == out_ch, spl = 2
    Cg = CH // 2
    key = jax.random.PRNGKey(0)
    k1, k2, k3, k4, k5 = jax.random.split(key, 5)

    x = jax.random.normal(k1, (N, CH, H, W), jnp.float32)
    w1 = jax.random.normal(k2, (Cg, Cg, 3, 3), jnp.float32) * 0.1
    b1 = jax.random.normal(k3, (Cg,), jnp.float32) * 0.1
    w2 = jax.random.normal(k4, (Cg, Cg, 3, 3), jnp.float32) * 0.1
    b2 = jax.random.normal(k5, (Cg,), jnp.float32) * 0.1

    y_ref = ref_split_dilation(x, w1, b1, w2, b2)

    # exact-precision path (f32 MXU inputs)
    y32 = split_dilation_forward(x, w1, b1, w2, b2, compute_dtype=jnp.float32)
    jax.block_until_ready(y32)
    assert y32.shape == (N, CH, H, W), y32.shape
    assert jnp.allclose(y32, y_ref, rtol=1e-4, atol=1e-4), \
        float(jnp.max(jnp.abs(y32 - y_ref)))

    # default fast path: bf16 MXU inputs, f32 accumulation
    y_bf16 = split_dilation_forward(x, w1, b1, w2, b2)
    jax.block_until_ready(y_bf16)
    assert jnp.allclose(y_bf16, y_ref, rtol=5e-2, atol=5e-2), \
        float(jnp.max(jnp.abs(y_bf16 - y_ref)))

    # multi-row-tile path (exercises the overlapped row-block layout)
    y_tiled = split_dilation_forward(x, w1, b1, w2, b2, tile_h=8,
                                     compute_dtype=jnp.float32)
    jax.block_until_ready(y_tiled)
    assert jnp.allclose(y_tiled, y_ref, rtol=1e-4, atol=1e-4), \
        float(jnp.max(jnp.abs(y_tiled - y_ref)))

    # per-group matmul path (auto-selected when 2*Cg exceeds the MXU tile)
    y_split = split_dilation_forward(x, w1, b1, w2, b2, compute_dtype=jnp.float32,
                                     force_split_groups=True)
    jax.block_until_ready(y_split)
    assert jnp.allclose(y_split, y_ref, rtol=1e-4, atol=1e-4), \
        float(jnp.max(jnp.abs(y_split - y_ref)))

    # NHWC fast path (no wrapper-side layout transposes)
    x_nhwc = jnp.transpose(x, (0, 2, 3, 1))
    y_nhwc = split_dilation_forward_nhwc(x_nhwc, w1, b1, w2, b2,
                                         compute_dtype=jnp.float32)
    jax.block_until_ready(y_nhwc)
    assert jnp.allclose(jnp.transpose(y_nhwc, (0, 3, 1, 2)), y_ref,
                        rtol=1e-4, atol=1e-4)

    print("KERNEL_OK")
</pallas_src>

<mosaic_0001>
module attributes {stable_mosaic.version = 11 : i64} {
  func.func @kernel(%arg0: i32, %arg1: i32, %arg2: memref<1x1x18x18x8xf32, #tpu.memory_space<vmem>>, %arg3: memref<3x24x8xf32, #tpu.memory_space<vmem>>, %arg4: memref<1x8xf32, #tpu.memory_space<vmem>>, %arg5: memref<1x16x128xf32, #tpu.memory_space<vmem>>) attributes {dimension_semantics = [#tpu.dimension_semantics<parallel>, #tpu.dimension_semantics<parallel>], iteration_bounds = array<i64: 2, 1>, scalar_prefetch = 0 : i64, scratch_operands = 0 : i64, tpu.core_type = #tpu.core_type<tc>, window_params = [{transform_indices = @transform_0, window_bounds = array<i64: 1, 1, 18, 18, 8>}, {pipeline_mode = #tpu.pipeline_mode<synchronous>, transform_indices = @transform_1, window_bounds = array<i64: 3, 24, 8>}, {pipeline_mode = #tpu.pipeline_mode<synchronous>, transform_indices = @transform_2, window_bounds = array<i64: 1, 8>}, {transform_indices = @transform_3, window_bounds = array<i64: 1, 16, 128>}]} {
    %c0 = arith.constant 0 : index
    %c0_0 = arith.constant 0 : index
    %c0_1 = arith.constant 0 : index
    %c0_2 = arith.constant 0 : index
    %c0_3 = arith.constant 0 : index
    %0 = vector.load %arg2[%c0, %c0_0, %c0_1, %c0_2, %c0_3] : memref<1x1x18x18x8xf32, #tpu.memory_space<vmem>>, vector<1x1x18x18x8xf32>
    %1 = vector.shape_cast %0 : vector<1x1x18x18x8xf32> to vector<18x18x8xf32>
    %c0_4 = arith.constant 0 : index
    %c0_5 = arith.constant 0 : index
    %c0_6 = arith.constant 0 : index
    %2 = vector.load %arg3[%c0_4, %c0_5, %c0_6] : memref<3x24x8xf32, #tpu.memory_space<vmem>>, vector<3x24x8xf32>
    %c0_7 = arith.constant 0 : index
    %c0_8 = arith.constant 0 : index
    %3 = vector.load %arg4[%c0_7, %c0_8] : memref<1x8xf32, #tpu.memory_space<vmem>>, vector<1x8xf32>
    %cst = arith.constant 0.000000e+00 : f32
    %4 = vector.broadcast %cst : f32 to vector<256x8xf32>
    %5 = vector.extract_strided_slice %1 {offsets = [0, 0, 0], sizes = [16, 18, 8], strides = [1, 1, 1]} : vector<18x18x8xf32> to vector<16x18x8xf32>
    %6 = vector.extract_strided_slice %5 {offsets = [0, 0, 0], sizes = [16, 16, 8], strides = [1, 1, 1]} : vector<16x18x8xf32> to vector<16x16x8xf32>
    %7 = vector.extract_strided_slice %5 {offsets = [0, 1, 0], sizes = [16, 16, 8], strides = [1, 1, 1]} : vector<16x18x8xf32> to vector<16x16x8xf32>
    %8 = vector.extract_strided_slice %5 {offsets = [0, 2, 0], sizes = [16, 16, 8], strides = [1, 1, 1]} : vector<16x18x8xf32> to vector<16x16x8xf32>
    %9 = tpu.concatenate %6, %7 in 2 : vector<16x16x8xf32>, vector<16x16x8xf32> -> vector<16x16x16xf32>
    %10 = tpu.concatenate %9, %8 in 2 : vector<16x16x16xf32>, vector<16x16x8xf32> -> vector<16x16x24xf32>
    %11 = vector.shape_cast %10 : vector<16x16x24xf32> to vector<256x24xf32>
    %12 = vector.extract_strided_slice %2 {offsets = [0, 0, 0], sizes = [1, 24, 8], strides = [1, 1, 1]} : vector<3x24x8xf32> to vector<1x24x8xf32>
    %13 = vector.shape_cast %12 : vector<1x24x8xf32> to vector<24x8xf32>
    %cst_9 = arith.constant dense<0.000000e+00> : vector<256x8xf32>
    %14 = tpu.matmul %11, %13, %cst_9 {dimension_numbers = #tpu.dot_dimension_numbers<[1], [0], [0], [1], [0, 0, 1, 1], [], []>} : vector<256x24xf32>, vector<24x8xf32>, vector<256x8xf32> -> vector<256x8xf32>
    %15 = arith.addf %4, %14 : vector<256x8xf32>
    %16 = vector.extract_strided_slice %1 {offsets = [1, 0, 0], sizes = [16, 18, 8], strides = [1, 1, 1]} : vector<18x18x8xf32> to vector<16x18x8xf32>
    %17 = vector.extract_strided_slice %16 {offsets = [0, 0, 0], sizes = [16, 16, 8], strides = [1, 1, 1]} : vector<16x18x8xf32> to vector<16x16x8xf32>
    %18 = vector.extract_strided_slice %16 {offsets = [0, 1, 0], sizes = [16, 16, 8], strides = [1, 1, 1]} : vector<16x18x8xf32> to vector<16x16x8xf32>
    %19 = vector.extract_strided_slice %16 {offsets = [0, 2, 0], sizes = [16, 16, 8], strides = [1, 1, 1]} : vector<16x18x8xf32> to vector<16x16x8xf32>
    %20 = tpu.concatenate %17, %18 in 2 : vector<16x16x8xf32>, vector<16x16x8xf32> -> vector<16x16x16xf32>
    %21 = tpu.concatenate %20, %19 in 2 : vector<16x16x16xf32>, vector<16x16x8xf32> -> vector<16x16x24xf32>
    %22 = vector.shape_cast %21 : vector<16x16x24xf32> to vector<256x24xf32>
    %23 = vector.extract_strided_slice %2 {offsets = [1, 0, 0], sizes = [1, 24, 8], strides = [1, 1, 1]} : vector<3x24x8xf32> to vector<1x24x8xf32>
    %24 = vector.shape_cast %23 : vector<1x24x8xf32> to vector<24x8xf32>
    %cst_10 = arith.constant dense<0.000000e+00> : vector<256x8xf32>
    %25 = tpu.matmul %22, %24, %cst_10 {dimension_numbers = #tpu.dot_dimension_numbers<[1], [0], [0], [1], [0, 0, 1, 1], [], []>} : vector<256x24xf32>, vector<24x8xf32>, vector<256x8xf32> -> vector<256x8xf32>
    %26 = arith.addf %15, %25 : vector<256x8xf32>
    %27 = vector.extract_strided_slice %1 {offsets = [2, 0, 0], sizes = [16, 18, 8], strides = [1, 1, 1]} : vector<18x18x8xf32> to vector<16x18x8xf32>
    %28 = vector.extract_strided_slice %27 {offsets = [0, 0, 0], sizes = [16, 16, 8], strides = [1, 1, 1]} : vector<16x18x8xf32> to vector<16x16x8xf32>
    %29 = vector.extract_strided_slice %27 {offsets = [0, 1, 0], sizes = [16, 16, 8], strides = [1, 1, 1]} : vector<16x18x8xf32> to vector<16x16x8xf32>
    %30 = vector.extract_strided_slice %27 {offsets = [0, 2, 0], sizes = [16, 16, 8], strides = [1, 1, 1]} : vector<16x18x8xf32> to vector<16x16x8xf32>
    %31 = tpu.concatenate %28, %29 in 2 : vector<16x16x8xf32>, vector<16x16x8xf32> -> vector<16x16x16xf32>
    %32 = tpu.concatenate %31, %30 in 2 : vector<16x16x16xf32>, vector<16x16x8xf32> -> vector<16x16x24xf32>
    %33 = vector.shape_cast %32 : vector<16x16x24xf32> to vector<256x24xf32>
    %34 = vector.extract_strided_slice %2 {offsets = [2, 0, 0], sizes = [1, 24, 8], strides = [1, 1, 1]} : vector<3x24x8xf32> to vector<1x24x8xf32>
    %35 = vector.shape_cast %34 : vector<1x24x8xf32> to vector<24x8xf32>
    %cst_11 = arith.constant dense<0.000000e+00> : vector<256x8xf32>
    %36 = tpu.matmul %33, %35, %cst_11 {dimension_numbers = #tpu.dot_dimension_numbers<[1], [0], [0], [1], [0, 0, 1, 1], [], []>} : vector<256x24xf32>, vector<24x8xf32>, vector<256x8xf32> -> vector<256x8xf32>
    %37 = arith.addf %26, %36 : vector<256x8xf32>
    %38 = vector.broadcast %3 : vector<1x8xf32> to vector<256x8xf32>
    %39 = arith.addf %37, %38 : vector<256x8xf32>
    %40 = vector.shape_cast %39 : vector<256x8xf32> to vector<16x16x8xf32>
    %41 = vector.extract_strided_slice %40 {offsets = [0, 0, 0], sizes = [16, 1, 8], strides = [1, 1, 1]} : vector<16x16x8xf32> to vector<16x1x8xf32>
    %42 = vector.shape_cast %41 : vector<16x1x8xf32> to vector<16x8xf32>
    %43 = vector.extract_strided_slice %40 {offsets = [0, 1, 0], sizes = [16, 1, 8], strides = [1, 1, 1]} : vector<16x16x8xf32> to vector<16x1x8xf32>
    %44 = vector.shape_cast %43 : vector<16x1x8xf32> to vector<16x8xf32>
    %45 = vector.extract_strided_slice %40 {offsets = [0, 2, 0], sizes = [16, 1, 8], strides = [1, 1, 1]} : vector<16x16x8xf32> to vector<16x1x8xf32>
    %46 = vector.shape_cast %45 : vector<16x1x8xf32> to vector<16x8xf32>
    %47 = vector.extract_strided_slice %40 {offsets = [0, 3, 0], sizes = [16, 1, 8], strides = [1, 1, 1]} : vector<16x16x8xf32> to vector<16x1x8xf32>
    %48 = vector.shape_cast %47 : vector<16x1x8xf32> to vector<16x8xf32>
    %49 = vector.extract_strided_slice %40 {offsets = [0, 4, 0], sizes = [16, 1, 8], strides = [1, 1, 1]} : vector<16x16x8xf32> to vector<16x1x8xf32>
    %50 = vector.shape_cast %49 : vector<16x1x8xf32> to vector<16x8xf32>
    %51 = vector.extract_strided_slice %40 {offsets = [0, 5, 0], sizes = [16, 1, 8], strides = [1, 1, 1]} : vector<16x16x8xf32> to vector<16x1x8xf32>
    %52 = vector.shape_cast %51 : vector<16x1x8xf32> to vector<16x8xf32>
    %53 = vector.extract_strided_slice %40 {offsets = [0, 6, 0], sizes = [16, 1, 8], strides = [1, 1, 1]} : vector<16x16x8xf32> to vector<16x1x8xf32>
    %54 = vector.shape_cast %53 : vector<16x1x8xf32> to vector<16x8xf32>
    %55 = vector.extract_strided_slice %40 {offsets = [0, 7, 0], sizes = [16, 1, 8], strides = [1, 1, 1]} : vector<16x16x8xf32> to vector<16x1x8xf32>
    %56 = vector.shape_cast %55 : vector<16x1x8xf32> to vector<16x8xf32>
    %57 = vector.extract_strided_slice %40 {offsets = [0, 8, 0], sizes = [16, 1, 8], strides = [1, 1, 1]} : vector<16x16x8xf32> to vector<16x1x8xf32>
    %58 = vector.shape_cast %57 : vector<16x1x8xf32> to vector<16x8xf32>
    %59 = vector.extract_strided_slice %40 {offsets = [0, 9, 0], sizes = [16, 1, 8], strides = [1, 1, 1]} : vector<16x16x8xf32> to vector<16x1x8xf32>
    %60 = vector.shape_cast %59 : vector<16x1x8xf32> to vector<16x8xf32>
    %61 = vector.extract_strided_slice %40 {offsets = [0, 10, 0], sizes = [16, 1, 8], strides = [1, 1, 1]} : vector<16x16x8xf32> to vector<16x1x8xf32>
    %62 = vector.shape_cast %61 : vector<16x1x8xf32> to vector<16x8xf32>
    %63 = vector.extract_strided_slice %40 {offsets = [0, 11, 0], sizes = [16, 1, 8], strides = [1, 1, 1]} : vector<16x16x8xf32> to vector<16x1x8xf32>
    %64 = vector.shape_cast %63 : vector<16x1x8xf32> to vector<16x8xf32>
    %65 = vector.extract_strided_slice %40 {offsets = [0, 12, 0], sizes = [16, 1, 8], strides = [1, 1, 1]} : vector<16x16x8xf32> to vector<16x1x8xf32>
    %66 = vector.shape_cast %65 : vector<16x1x8xf32> to vector<16x8xf32>
    %67 = vector.extract_strided_slice %40 {offsets = [0, 13, 0], sizes = [16, 1, 8], strides = [1, 1, 1]} : vector<16x16x8xf32> to vector<16x1x8xf32>
    %68 = vector.shape_cast %67 : vector<16x1x8xf32> to vector<16x8xf32>
    %69 = vector.extract_strided_slice %40 {offsets = [0, 14, 0], sizes = [16, 1, 8], strides = [1, 1, 1]} : vector<16x16x8xf32> to vector<16x1x8xf32>
    %70 = vector.shape_cast %69 : vector<16x1x8xf32> to vector<16x8xf32>
    %71 = vector.extract_strided_slice %40 {offsets = [0, 15, 0], sizes = [16, 1, 8], strides = [1, 1, 1]} : vector<16x16x8xf32> to vector<16x1x8xf32>
    %72 = vector.shape_cast %71 : vector<16x1x8xf32> to vector<16x8xf32>
    %73 = tpu.concatenate %42, %44 in 1 : vector<16x8xf32>, vector<16x8xf32> -> vector<16x16xf32>
    %74 = tpu.concatenate %46, %48 in 1 : vector<16x8xf32>, vector<16x8xf32> -> vector<16x16xf32>
    %75 = tpu.concatenate %50, %52 in 1 : vector<16x8xf32>, vector<16x8xf32> -> vector<16x16xf32>
    %76 = tpu.concatenate %54, %56 in 1 : vector<16x8xf32>, vector<16x8xf32> -> vector<16x16xf32>
    %77 = tpu.concatenate %58, %60 in 1 : vector<16x8xf32>, vector<16x8xf32> -> vector<16x16xf32>
    %78 = tpu.concatenate %62, %64 in 1 : vector<16x8xf32>, vector<16x8xf32> -> vector<16x16xf32>
    %79 = tpu.concatenate %66, %68 in 1 : vector<16x8xf32>, vector<16x8xf32> -> vector<16x16xf32>
    %80 = tpu.concatenate %70, %72 in 1 : vector<16x8xf32>, vector<16x8xf32> -> vector<16x16xf32>
    %81 = tpu.concatenate %73, %74 in 1 : vector<16x16xf32>, vector<16x16xf32> -> vector<16x32xf32>
    %82 = tpu.concatenate %75, %76 in 1 : vector<16x16xf32>, vector<16x16xf32> -> vector<16x32xf32>
    %83 = tpu.concatenate %77, %78 in 1 : vector<16x16xf32>, vector<16x16xf32> -> vector<16x32xf32>
    %84 = tpu.concatenate %79, %80 in 1 : vector<16x16xf32>, vector<16x16xf32> -> vector<16x32xf32>
    %85 = tpu.concatenate %81, %82 in 1 : vector<16x32xf32>, vector<16x32xf32> -> vector<16x64xf32>
    %86 = tpu.concatenate %83, %84 in 1 : vector<16x32xf32>, vector<16x32xf32> -> vector<16x64xf32>
    %87 = tpu.concatenate %85, %86 in 1 : vector<16x64xf32>, vector<16x64xf32> -> vector<16x128xf32>
    %c0_12 = arith.constant 0 : index
    %c0_13 = arith.constant 0 : index
    %c0_14 = arith.constant 0 : index
    %88 = vector.load %arg5[%c0_12, %c0_13, %c0_14] : memref<1x16x128xf32, #tpu.memory_space<vmem>>, vector<1x16x128xf32>
    %89 = vector.shape_cast %88 : vector<1x16x128xf32> to vector<16x128xf32>
    %90 = vector.shape_cast %87 : vector<16x128xf32> to vector<1x16x128xf32>
    tpu.vector_store %arg5[%c0_12, %c0_13, %c0_14], %90 {strides = array<i32>} : memref<1x16x128xf32, #tpu.memory_space<vmem>>, vector<1x16x128xf32>,
    return
  }
  func.func @transform_0(%arg0: i32, %arg1: i32) -> (i32, i32, i32, i32, i32) {
    %c0_i32 = arith.constant 0 : i32
    %c0_i32_0 = arith.constant 0 : i32
    %c0_i32_1 = arith.constant 0 : i32
    %c0_i32_2 = arith.constant 0 : i32
    return %arg0, %arg1, %c0_i32, %c0_i32_0, %c0_i32_1 : i32, i32, i32, i32, i32
  }
  func.func @transform_1(%arg0: i32, %arg1: i32) -> (i32, i32, i32) {
    %c0_i32 = arith.constant 0 : i32
    %c0_i32_0 = arith.constant 0 : i32
    %c0_i32_1 = arith.constant 0 : i32
    %c0_i32_2 = arith.constant 0 : i32
    return %c0_i32, %c0_i32_0, %c0_i32_1 : i32, i32, i32
  }
  func.func @transform_2(%arg0: i32, %arg1: i32) -> (i32, i32) {
    %c0_i32 = arith.constant 0 : i32
    %c0_i32_0 = arith.constant 0 : i32
    %c0_i32_1 = arith.constant 0 : i32
    return %c0_i32, %c0_i32_0 : i32, i32
  }
  func.func @transform_3(%arg0: i32, %arg1: i32) -> (i32, i32, i32) {
    %c0_i32 = arith.constant 0 : i32
    %c0_i32_0 = arith.constant 0 : i32
    return %arg0, %arg1, %c0_i32 : i32, i32, i32
  }
}

</mosaic_0001>

<bundles_post_ra>
// kernel: tpu_custom_call.1
= control target key start
LH: loop header
LB: loop body
LE: loop exit
PB: predicated region body
PF: predicated region fallthrough
CT: control target
= control target key end

     0   :  { %8 = vsyncpa [#allocation3], 0  ;;  %s3725_s0 = inlined_call_operand.vmem [shape: f32[2,1,18,18,8], index: 0, kind: input, shape index: {}]   ;;  %s3726_s1 = inlined_call_operand.vmem [shape: f32[3,24,8], index: 1, kind: input, shape index: {}]   ;;  %s3727_s2 = inlined_call_operand.vmem [shape: f32[1,8], index: 2, kind: input, shape index: {}]   ;;  %s3728_s3 = inlined_call_operand.hbm [shape: f32[2,16,128], index: 3, kind: output, shape index: {}]  }
   0x1   :  { %10 = vsyncpa [#allocation3 + $0x1], 0  ;;  %s2224_s12 = smov 0   ;;  %s2226_s13 = smov 0  }
   0x2   :  { %s2228_s14 = smov 0   ;;  %s2230_s15 = smov 0  }
   0x3   :  { %s2232_s16 = smov 0   ;;  %s2234_s17 = smov 0  }
   0x4 LB: > { %s1939_s18 = sadd.s32 4294967295, %s2197_s17   ;;  %s1940_s19 = sadd.s32 4294967294, %s2197_s17   ;;  %s2197_s17 = sphi %s2234_s17, %s16_s17   ;;  %s2193_s16 = sphi %s2232_s16, %s3741_s16   ;;  %s2189_s15 = sphi %s2230_s15, %s3740_s15   ;;  %s2185_s14 = sphi %s2228_s14, %s3739_s14   ;;  %s2181_s13 = sphi %s2226_s13, %s3738_s13   ;;  %s2177_s12 = sphi %s2224_s12, %s3737_s12  }
   0x5   : > { %s28_s20 = sadd.s32 1, %s2193_s16  ;;  %s107_s21 = sadd.s32 1, %s2185_s14 }
   0x6   : > { %p30_p0 = scmp.ge.s32.totalorder %s28_s20, 2  ;;  %p117_p1 = scmp.ne.s32.totalorder %s2185_s14, %s2181_s13 }
   0x7   : > { %p118_p2 = scmp.eq.s32.totalorder %s1939_s18, 1  ;;  %p123_p3 = scmp.ne.s32.totalorder %s2181_s13, %s2177_s12 }
   0x8   : > { %s3743_s20 = smov (%p30_p0, %s28_s20), 0  ;;  %p124_p5 = scmp.eq.s32.totalorder %s1940_s19, 1 }
   0x9   : > { %p2264_p4 = por %p118_p2, %p117_p1  ;;  %s102_s23 = ssub.s32 %s2193_s16, %s3743_s20 }
   0xa   : > { %p1943_p6 = scmp.ge.s32.totalorder %s2197_s17, 1  ;;  %p105_p7 = scmp.eq.s32.totalorder %s102_s23, 0 }
   0xb   : > { %p2271_p8 = por %p124_p5, %p123_p3  ;;  %p160_p9 = scmp.lt.s32.totalorder %s2197_s17, 3 }
   0xc   : > { %s2277_s25 = scalar_select %p105_p7, %s2185_s14, %s107_s21  }
   0xd   : > { %p161_p10 = pnand %p1943_p6, %p160_p9 }
   0xf   : > { %164 = sbr.rel (%p161_p10) target bundleno = 974 (0x3ce), region = 32 }
  0x14   : > { %p188_p11 = scmp.lt.s32.totalorder %s2189_s15, 1  ;;  %vm310_vm0 = vcmask 1046528   ;;  %s2199_s4 = smov 8   ;;  %vm520_vm1 = vcmask 1045504   ;;  %vm487_vm2 = vcmask 64512   ;;  %vm697_vm3 = vcmask 130048  }
  0x15   : > { %s2200_s5 = smov 16   ;;  %vm759_vm4 = vcmask 195584   ;;  %vm1326_vm5 = vcmask 1043459   ;;  %vm1332_vm6 = vcmask 1045509   ;;  %vm1320_vm7 = vcmask 1041409   ;;  %s2201_s11 = smov 32  }
  0x16   : > { %s189_s26 = scalar_select %p188_p11, %s2189_s15, 1  ;;  %vm1338_vm8 = vcmask 1047559   ;;  %vm1323_vm9 = vcmask 1042434   ;;  %vm1329_vm10 = vcmask 1044484   ;;  %vm1335_vm11 = vcmask 1046534  }
  0x17   : > { %vm1795_vm12 = vcmask 1043456   ;;  %vm1807_vm13 = vcmask 261120   ;;  %s185_s18 = sand.u32 1, %s2181_s13   ;;  %vm1834_vm14 = vcmask 523264   ;;  %s2047_s23 = sshll.u32 %s2189_s15, 4 }
  0x18   : > { %s2057_s27 = smul.u32 432, %s189_s26  ;;  %s1944_s19 = sshll.u32 %s185_s18, 4 }
  0x19   : > { %s187_s21 = scalar_lea.vmem [#allocation2], %s1944_s19  ;;  %s1853_s28 = scalar_lea.hbm %s3728_s3, %s2047_s23 }
  0x1a   : > { %s2284_s30 = scalar_lea.vmem %s3725_s0, %s2057_s27  ;;  %s1854_s29 = sshll.u32 %s187_s21, 4  ;;  %s1855_s29 = int_to_ptr.vmem [resolvable:$true] %s1854_s29 }
  0x1b   : > { %v2287_v0 = vld [vmem:[%s2284_s30 + $0x30] sm:$0xff]  ;;  %v2290_v1 = vld [vmem:[%s2284_s30 + $0x38] sm:$0xff]  ;;  %v2293_v2 = vld [vmem:[%s2284_s30] sm:$0xff]  ;;  %s1856_s6 = sshll.u32 %s1853_s28, 4  ;;  %s1840_s7 = scalar_lea.sflag [#allocation3], %s185_s18  ;;  %s1857_s6 = int_to_ptr.hbm [resolvable:$true] %s1856_s6 }
  0x1c   : > { %v321_v3 = vrot.slane %v2287_v0, 1  ;;  %v322_v4 = vrot.slane %v2290_v1, 1  ;;  %v2298_v5 = vld [vmem:[%s2284_s30 + $0x8] sm:$0xff]  ;;  %v311_v6 = vrot.slane %v2293_v2, 1  ;;  %v2303_v8 = vld [vmem:[%s2284_s30 + $0x138] sm:$0xff]  ;;  %v2306_v9 = vld [vmem:[%s2284_s30 + $0x140] sm:$0xff] }
  0x1d   : > { %v312_v7 = vrot.slane %v2298_v5, 1  ;;  %v2310_v11 = vld [vmem:[%s2284_s30 + $0x18] sm:$0xff]  ;;  %v2313_v12 = vld [vmem:[%s2284_s30 + $0x20] sm:$0xff]  ;;  %v376_v13 = vrot.slane %v2303_v8, 1  ;;  %v377_v14 = vrot.slane %v2306_v9, 1  ;;  %v531_v16 = vrot.slane %v2287_v0, 2 }
  0x1e   : > { %v323_v10 = vsel %vm310_vm0, %v321_v3, %v322_v4  ;;  %v532_v17 = vrot.slane %v2290_v1, 2  ;;  %v316_v19 = vrot.slane %v2310_v11, 1  ;;  %v317_v20 = vrot.slane %v2313_v12, 1  ;;  %v206_v30 = vld [vmem:[%s2284_s30 + $0x40] sm:$0x3]  ;;  %v2357_v49 = vld [vmem:[%s2284_s30 + $0x48] sm:$0xff] }
  0x1f   : > { %399 = vrot.lane.b32.xlu0 %v323_v10, %s2199_s4  ;;  %v313_v15 = vsel %vm310_vm0, %v311_v6, %v312_v7  ;;  %v378_v18 = vsel %vm310_vm0, %v376_v13, %v377_v14  ;;  %v521_v21 = vrot.slane %v2293_v2, 2  ;;  %v522_v22 = vrot.slane %v2298_v5, 2  ;;  %v200_v34 = vld [vmem:[%s2284_s30 + $0x10] sm:$0x3]  ;;  %v203_v36 = vld [vmem:[%s2284_s30 + $0x28] sm:$0x3] }
  0x20   : > { %391 = vrot.lane.b32.xlu1 %v313_v15, %s2199_s4  ;;  %443 = vrot.lane.b32.xlu2 %v378_v18, %s2199_s4  ;;  %v533_v23 = vsel %vm520_vm1, %v531_v16, %v532_v17  ;;  %v318_v24 = vsel %vm310_vm0, %v316_v19, %v317_v20  ;;  %v526_v26 = vrot.slane %v2310_v11, 2  ;;  %v527_v27 = vrot.slane %v2313_v12, 2  ;;  %v239_v42 = vld [vmem:[%s2284_s30 + $0x148] sm:$0x3]  ;;  %v2360_v50 = vld [vmem:[%s2284_s30 + $0x50] sm:$0xff]  ;;  %s2133_s8 = sshra.s32 %s1857_s6, 4  ;;  %s2134_s8 = int_to_ptr.hbm [resolvable:$true] %s2133_s8 }
  0x21   : > { %v523_v25 = vsel %vm520_vm1, %v521_v21, %v522_v22  ;;  %v586_v28 = vrot.slane %v2303_v8, 2  ;;  %v587_v29 = vrot.slane %v2306_v9, 2  ;;  %v324_v31 = vrot.slane %v206_v30, 1  ;;  %v2373_v59 = vld [vmem:[%s2284_s30 + $0x150] sm:$0xff]  ;;  %v2376_v60 = vld [vmem:[%s2284_s30 + $0x158] sm:$0xff]  ;;  %v2397_v21 = vld [vmem:[%s2284_s30 + $0x60] sm:$0xff]  ;;  %p2140_p1 = scmp.lt.s32.totalorder %s2134_s8, %s3728_s3 }
  0x22   : > { %v528_v32 = vsel %vm520_vm1, %v526_v26, %v527_v27  ;;  %v534_v37 = vrot.slane %v206_v30, 2  ;;  %v314_v38 = vrot.slane %v200_v34, 1  ;;  %v319_v39 = vrot.slane %v203_v36, 1  ;;  %v209_v6 = vld [vmem:[%s2284_s30 + $0x58] sm:$0x3]  ;;  %v2415_v30 = vld [vmem:[%s2284_s30 + $0x170] sm:$0xff] }
  0x23   : > { %v588_v33 = vsel %vm520_vm1, %v586_v28, %v587_v29  ;;  %v325_v35 = vsel %vm310_vm0, %v322_v4, %v324_v31  ;;  %v379_v44 = vrot.slane %v239_v42, 1  ;;  %v524_v45 = vrot.slane %v200_v34, 2  ;;  %v2410_v28 = vld [vmem:[%s2284_s30 + $0x168] sm:$0xff]  ;;  %v212_v34 = vld [vmem:[%s2284_s30 + $0x70] sm:$0x3]  ;;  %s2135_s9 = scalar_lea.hbm %s2134_s8, 16 }
  0x24   : > { %v535_v40 = vsel %vm520_vm1, %v532_v17, %v534_v37  ;;  %v315_v41 = vsel %vm310_vm0, %v312_v7, %v314_v38  ;;  %v320_v43 = vsel %vm310_vm0, %v317_v20, %v319_v39  ;;  %v529_v46 = vrot.slane %v203_v36, 2  ;;  %p2136_p12 = scmp.ne.s32.totalorder %s2134_s8, %s2135_s9  ;;  %s2139_s10 = scalar_lea.hbm %s3728_s3, 32 }
  0x25   : > { %v380_v47 = vsel %vm310_vm0, %v377_v14, %v379_v44  ;;  %v525_v48 = vsel %vm520_vm1, %v522_v22, %v524_v45  ;;  %v589_v52 = vrot.slane %v239_v42, 2  ;;  %v326_v53 = vrot.slane %v2357_v49, 1  ;;  %v242_v14 = vld [vmem:[%s2284_s30 + $0x160] sm:$0x3]  ;;  %v2400_v22 = vld [vmem:[%s2284_s30 + $0x68] sm:$0xff]  ;;  %p2141_p2 = scmp.lt.s32.totalorder %s2139_s10, %s2135_s9 }
  0x26   : > { %v530_v51 = vsel %vm520_vm1, %v527_v27, %v529_v46  ;;  %v327_v54 = vrot.slane %v2360_v50, 1  ;;  %v536_v55 = vrot.slane %v2357_v49, 2  ;;  %v537_v57 = vrot.slane %v2360_v50, 2  ;;  %v245_v42 = vld [vmem:[%s2284_s30 + $0x178] sm:$0x3]  ;;  %p2137_p13 = pnand %p2136_p12, %p2264_p4 }
  0x27   : > { %609 = vrot.lane.b32.xlu0 %v533_v23, %s2200_s5  ;;  %v590_v56 = vsel %vm520_vm1, %v587_v29, %v589_v52  ;;  %v381_v62 = vrot.slane %v2373_v59, 1  ;;  %v382_v63 = vrot.slane %v2376_v60, 1  ;;  %v591_v3 = vrot.slane %v2373_v59, 2  ;;  %v2434_v46 = vld [vmem:[%s2284_s30 + $0x78] sm:$0xff]  ;;  %p2142_p3 = por %p2141_p2, %p2140_p1 }
  0x28   : > { %395 = vrot.lane.b32.xlu1 %v318_v24, %s2199_s4  ;;  %601 = vrot.lane.b32.xlu2 %v523_v25, %s2200_s5  ;;  %v328_v58 = vsel %vm310_vm0, %v326_v53, %v327_v54  ;;  %v538_v61 = vsel %vm520_vm1, %v536_v55, %v537_v57  ;;  %v592_v4 = vrot.slane %v2376_v60, 2  ;;  %v329_v7 = vrot.slane %v209_v6, 1  ;;  %v2448_v55 = vld [vmem:[%s2284_s30 + $0x188] sm:$0xff]  ;;  %p2138_p0 = pneg %p2137_p13 }
  0x29   : > { %v383_v10 = vsel %vm310_vm0, %v381_v62, %v382_v63  ;;  %v539_v16 = vrot.slane %v209_v6, 2  ;;  %v384_v17 = vrot.slane %v242_v14, 1  ;;  %v594_v18 = vrot.slane %v242_v14, 2  ;;  %v252_v6 = vld [vmem:[%s3726_s1] sm:$0xff]  ;;  %v215_v14 = vld [vmem:[%s2284_s30 + $0x88] sm:$0x3] }
  0x2a   : > { %v593_v13 = vsel %vm520_vm1, %v591_v3, %v592_v4  ;;  %v330_v15 = vsel %vm310_vm0, %v327_v54, %v329_v7  ;;  %v331_v24 = vrot.slane %v2397_v21, 1  ;;  %v332_v25 = vrot.slane %v2400_v22, 1  ;;  %v2445_v54 = vld [vmem:[%s2284_s30 + $0x180] sm:$0xff]  ;;  %p2143_p5 = pnand %p2142_p3, %p2138_p0 }
  0x2b   : > { %v540_v19 = vsel %vm520_vm1, %v537_v57, %v539_v16  ;;  %v385_v20 = vsel %vm310_vm0, %v382_v63, %v384_v17  ;;  %v595_v23 = vsel %vm520_vm1, %v592_v4, %v594_v18  ;;  %v541_v26 = vrot.slane %v2397_v21, 2  ;;  %v253_v4 = vld [vmem:[%s3726_s1 + $0x8] sm:$0xff]  ;;  %v2484_v18 = vld [vmem:[%s3726_s1 + $0x38] sm:$0xff] }
  0x2c   : > { %v542_v27 = vrot.slane %v2400_v22, 2  ;;  %v386_v29 = vrot.slane %v2410_v28, 1  ;;  %v333_v31 = vsel %vm310_vm0, %v331_v24, %v332_v25  ;;  %v596_v36 = vrot.slane %v2410_v28, 2  ;;  %v2492_v24 = vld [vmem:[%s3726_s1 + $0x30] sm:$0xff] }
  0x2d   : > { %v597_v37 = vrot.slane %v2415_v30, 2  ;;  %v334_v38 = vrot.slane %v212_v34, 1  ;;  %v544_v39 = vrot.slane %v212_v34, 2  ;;  %v389_v44 = vrot.slane %v245_v42, 1  ;;  %v256_v34 = vld [vmem:[%s3726_s1 + $0x20] sm:$0xff] }
  0x2e   : > { %v599_v45 = vrot.slane %v245_v42, 2  ;;  %v546_v57 = vrot.slane %v2434_v46, 2  ;;  %v733_v62 = vrot.slane %v2445_v54, 1  ;;  %v734_v63 = vrot.slane %v2448_v55, 1 }
  0x2f   : > { %605 = vrot.lane.b32.xlu0 %v528_v32, %s2200_s5  ;;  %v387_v32 = vrot.slane %v2415_v30, 1  ;;  %v746_v3 = vrot.slane %v2445_v54, 2  ;;  %v339_v17 = vrot.slane %v215_v14, 1 }
  0x30   : > { %653 = vrot.lane.b32.xlu1 %v588_v33, %s2200_s5  ;;  %401 = vrot.lane.b32.xlu2 %v325_v35, %s2199_s4  ;;  %v543_v33 = vsel %vm520_vm1, %v541_v26, %v542_v27  ;;  %v600_v53 = vsel %vm520_vm1, %v597_v37, %v599_v45  ;;  %v257_v26 = vld [vmem:[%s3726_s1 + $0x28] sm:$0xff] }
  0x31   : > { %v388_v35 = vsel %vm310_vm0, %v386_v29, %v387_v32  ;;  %869 = vmatpush.msra.mxu0 %v257_v26  ;;  %2048 = vmatpush.msra.mxu3 %v257_v26  ;;  %v2528_v45 = vld [vmem:[%s2284_s30 + $0x128] sm:$0xff] }
  0x32   : > { %v2555_v26 = vld [vmem:[%s2284_s30 + $0xa8] sm:$0xff] }
  0x33   : > { %870 = vmatpush.msra.mxu0 %v256_v34  ;;  %2049 = vmatpush.msra.mxu3 %v256_v34 }
  0x37   : > { %611 = vrot.lane.b32.xlu0 %v535_v40, %s2200_s5  ;;  %v598_v40 = vsel %vm520_vm1, %v596_v36, %v597_v37 }
  0x38   : > { %393 = vrot.lane.b32.xlu1 %v315_v41, %s2199_s4  ;;  %397 = vrot.lane.b32.xlu2 %v320_v43, %s2199_s4  ;;  %v335_v41 = vsel %vm310_vm0, %v332_v25, %v334_v38  ;;  %v545_v43 = vsel %vm520_vm1, %v542_v27, %v544_v39  ;;  %v255_v39 = vld [vmem:[%s3726_s1 + $0x18] sm:$0xff] }
  0x39   : > { %871 = vmatpush.msra.mxu0 %v255_v39  ;;  %2050 = vmatpush.msra.mxu3 %v255_v39 }
  0x3f   : > { %445 = vrot.lane.b32.xlu0 %v380_v47, %s2199_s4  ;;  %v336_v47 = vrot.slane %v2434_v46, 1 }
  0x40   : > { %603 = vrot.lane.b32.xlu1 %v525_v48, %s2200_s5  ;;  %607 = vrot.lane.b32.xlu2 %v530_v51, %s2200_s5  ;;  %v2439_v48 = vld [vmem:[%s2284_s30 + $0x80] sm:$0xff]  ;;  %v390_v51 = vsel %vm310_vm0, %v387_v32, %v389_v44  ;;  %v2506_v32 = vld [vmem:[%s2284_s30 + $0x98] sm:$0xff] }
  0x41   : > { %v337_v52 = vrot.slane %v2439_v48, 1  ;;  %v342_v37 = vrot.slane %v2506_v32, 1  ;;  %v552_v42 = vrot.slane %v2506_v32, 2  ;;  %v2525_v44 = vld [vmem:[%s2284_s30 + $0x120] sm:$0xff] }
  0x43   : > { %v340_v27 = vsel %vm310_vm0, %v337_v52, %v339_v17 }
  0x47   : > { %655 = vrot.lane.b32.xlu0 %v590_v56, %s2200_s5  ;;  %v338_v56 = vsel %vm310_vm0, %v336_v47, %v337_v52  ;;  %v372_v52 = vrot.slane %v2528_v45, 1 }
  0x48   : > { %403 = vrot.lane.b32.xlu1 %v328_v58, %s2199_s4  ;;  %613 = vrot.lane.b32.xlu2 %v538_v61, %s2200_s5  ;;  %v547_v58 = vrot.slane %v2439_v48, 2  ;;  %v254_v61 = vld [vmem:[%s3726_s1 + $0x10] sm:$0xff] }
  0x49   : > { %988 = vmatpush.msra.mxu1 %v254_v61  ;;  %2051 = vmatpush.msrb.mxu3 %v254_v61 }
  0x4a   : > { %v548_v7 = vsel %vm520_vm1, %v546_v57, %v547_v58  ;;  %v218_v57 = vld [vmem:[%s2284_s30 + $0xa0] sm:$0x3] }
  0x4b   : > { %989 = vmatpush.msra.mxu1 %v253_v4  ;;  %2052 = vmatpush.msrb.mxu3 %v253_v4 }
  0x4d   : > { %990 = vmatpush.msra.mxu1 %v252_v6  ;;  %2053 = vmatpush.msrb.mxu3 %v252_v6  ;;  %v554_v6 = vrot.slane %v218_v57, 2 }
  0x4f   : > { %447 = vrot.lane.b32.xlu0 %v383_v10, %s2199_s4  ;;  %v747_v10 = vrot.slane %v2448_v55, 2 }
  0x50   : > { %657 = vrot.lane.b32.xlu1 %v593_v13, %s2200_s5  ;;  %405 = vrot.lane.b32.xlu2 %v330_v15, %s2199_s4  ;;  %v735_v13 = vsel %vm310_vm0, %v733_v62, %v734_v63  ;;  %v2475_v15 = vld [vmem:[%s3726_s1 + $0x40] sm:$0xff] }
  0x51   : > { %v748_v16 = vsel %vm520_vm1, %v746_v3, %v747_v10  ;;  %1136 = vmatpush.msra.mxu2 %v2475_v15  ;;  %v236_v3 = vld [vmem:[%s2284_s30 + $0x130] sm:$0x3] }
  0x53   : > { %1137 = vmatpush.msra.mxu2 %v2484_v18 }
  0x55   : > { %1138 = vmatpush.msra.mxu2 %v2492_v24 }
  0x57   : > { %615 = vrot.lane.b32.xlu0 %v540_v19, %s2200_s5  ;;  %v549_v19 = vrot.slane %v215_v14, 2  ;;  %v584_v14 = vrot.slane %v236_v3, 2 }
  0x58   : > { %449 = vrot.lane.b32.xlu1 %v385_v20, %s2199_s4  ;;  %659 = vrot.lane.b32.xlu2 %v595_v23, %s2200_s5  ;;  %v248_v20 = vld [vmem:[%s2284_s30 + $0x190] sm:$0x3] }
  0x59   : > { %v736_v23 = vrot.slane %v248_v20, 1  ;;  %v550_v29 = vsel %vm520_vm1, %v547_v58, %v549_v19  ;;  %v344_v58 = vrot.slane %v218_v57, 1 }
  0x5b   : > { %v345_v4 = vsel %vm310_vm0, %v342_v37, %v344_v58 }
  0x5f   : > { %407 = vrot.lane.b32.xlu0 %v333_v31, %s2199_s4  ;;  %v2503_v31 = vld [vmem:[%s2284_s30 + $0x90] sm:$0xff] }
  0x60   : > { %617 = vrot.lane.b32.xlu1 %v543_v33, %s2200_s5  ;;  %451 = vrot.lane.b32.xlu2 %v388_v35, %s2199_s4  ;;  %v737_v33 = vsel %vm310_vm0, %v734_v63, %v736_v23  ;;  %v749_v35 = vrot.slane %v248_v20, 2  ;;  %v341_v36 = vrot.slane %v2503_v31, 1  ;;  %v551_v38 = vrot.slane %v2503_v31, 2 }
  0x61   : > { %v555_v20 = vsel %vm520_vm1, %v552_v42, %v554_v6 }
  0x62   : > { %v553_v47 = vsel %vm520_vm1, %v551_v38, %v552_v42 }
  0x67   : > { %661 = vrot.lane.b32.xlu0 %v598_v40, %s2200_s5 }
  0x68   : > { %409 = vrot.lane.b32.xlu1 %v335_v41, %s2199_s4  ;;  %619 = vrot.lane.b32.xlu2 %v545_v43, %s2200_s5  ;;  %v750_v41 = vsel %vm520_vm1, %v747_v10, %v749_v35  ;;  %v343_v43 = vsel %vm310_vm0, %v341_v36, %v342_v37  ;;  %v374_v10 = vrot.slane %v236_v3, 1  ;;  %v556_v36 = vrot.slane %v2555_v26, 2 }
  0x6a   : > { %v375_v23 = vsel %vm310_vm0, %v372_v52, %v374_v10 }
  0x6f   : > { %453 = vrot.lane.b32.xlu0 %v390_v51, %s2199_s4  ;;  %v371_v51 = vrot.slane %v2525_v44, 1 }
  0x70   : > { %663 = vrot.lane.b32.xlu1 %v600_v53, %s2200_s5  ;;  %411 = vrot.lane.b32.xlu2 %v338_v56, %s2199_s4  ;;  %v581_v53 = vrot.slane %v2525_v44, 2  ;;  %v582_v56 = vrot.slane %v2528_v45, 2 }
  0x71   : > { %v373_v62 = vsel %vm310_vm0, %v371_v51, %v372_v52  ;;  %v2582_v51 = vld [vmem:[%s2284_s30 + $0xc8] sm:$0xff] }
  0x72   : > { %v583_v63 = vsel %vm520_vm1, %v581_v53, %v582_v56 }
  0x77   : > { %621 = vrot.lane.b32.xlu0 %v548_v7, %s2200_s5 }
  0x78   : > { %738 = vrot.lane.b32.xlu1 %v735_v13, %s2199_s4  ;;  %751 = vrot.lane.b32.xlu2 %v748_v16, %s2200_s5 }
  0x7a   : > { %v2494_v25 = vpop.permute.xlu2 %443 }
  0x7f   : > { %413 = vrot.lane.b32.xlu0 %v340_v27, %s2199_s4  ;;  %v2558_v27 = vld [vmem:[%s2284_s30 + $0xb0] sm:$0xff] }
  0x80   : > { %623 = vrot.lane.b32.xlu1 %v550_v29, %s2200_s5  ;;  %740 = vrot.lane.b32.xlu2 %v737_v33, %s2199_s4  ;;  %v585_v29 = vsel %vm520_vm1, %v582_v56, %v584_v14  ;;  %v347_v33 = vrot.slane %v2558_v27, 1  ;;  %v557_v37 = vrot.slane %v2558_v27, 2 }
  0x82   : > { %v602_v40 = vpop.permute.xlu2 %601  ;;  %v558_v42 = vsel %vm520_vm1, %v556_v36, %v557_v37 }
  0x87   : > { %753 = vrot.lane.b32.xlu0 %v750_v41, %s2200_s5  ;;  %v221_v41 = vld [vmem:[%s2284_s30 + $0xb8] sm:$0x3] }
  0x88   : > { %415 = vrot.lane.b32.xlu1 %v343_v43, %s2199_s4  ;;  %625 = vrot.lane.b32.xlu2 %v553_v47, %s2200_s5  ;;  %v349_v43 = vrot.slane %v221_v41, 1  ;;  %v2579_v47 = vld [vmem:[%s2284_s30 + $0xc0] sm:$0xff]  ;;  %v559_v53 = vrot.slane %v221_v41, 2 }
  0x89   : > { %v351_v58 = vrot.slane %v2579_v47, 1  ;;  %v561_v10 = vrot.slane %v2579_v47, 2 }
  0x8a   : > { %v2539_v61 = vpop.permute.xlu2 %401  ;;  %v350_v52 = vsel %vm310_vm0, %v347_v33, %v349_v43  ;;  %v560_v6 = vsel %vm520_vm1, %v557_v37, %v559_v53  ;;  %v2660_v53 = vld [vmem:[%s2284_s30 + $0xf8] sm:$0xff] }
  0x8f   : > { %439 = vrot.lane.b32.xlu0 %v373_v62, %s2199_s4  ;;  %v352_v62 = vrot.slane %v2582_v51, 1 }
  0x90   : > { %649 = vrot.lane.b32.xlu1 %v583_v63, %s2200_s5  ;;  %417 = vrot.lane.b32.xlu2 %v345_v4, %s2199_s4  ;;  %v514_v63 = vsel %vm487_vm2, %v2303_v8, %v2494_v25 }
  0x91   : > { %v400_v7 = vpop.permute.xlu0 %399  ;;  %v353_v25 = vsel %vm310_vm0, %v351_v58, %v352_v62  ;;  %v362_v58 = vrot.slane %v2660_v53, 1 }
  0x92   : > { %v392_v13 = vpop.permute.xlu1 %391  ;;  %v398_v17 = vpop.permute.xlu2 %397  ;;  %v492_v34 = vsel %vm487_vm2, %v2287_v0, %v400_v7  ;;  %v562_v7 = vrot.slane %v2582_v51, 2 }
  0x93   : > { %v488_v16 = vsel %vm487_vm2, %v2293_v2, %v392_v13  ;;  %v346_v2 = vrot.slane %v2555_v26, 1  ;;  %v491_v8 = vsel %vm487_vm2, %v2313_v12, %v398_v17  ;;  %v224_v13 = vld [vmem:[%s2284_s30 + $0xd0] sm:$0x3]  ;;  %v493_v17 = vsel %vm487_vm2, %v2290_v1, %v2539_v61  ;;  %v2635_v61 = vld [vmem:[%s2284_s30 + $0xd8] sm:$0xff] }
  0x94   : > { %v698_v19 = vsel %vm697_vm3, %v488_v16, %v602_v40  ;;  %v563_v16 = vsel %vm520_vm1, %v561_v10, %v562_v7  ;;  %v354_v12 = vrot.slane %v224_v13, 1 }
  0x95   : > { %1978 = vmatmul.msk.f32.vlgmr.msra.gmra.mxu1 %vm759_vm4, %v698_v19  ;;  %v348_v40 = vsel %vm310_vm0, %v346_v2, %v347_v33  ;;  %v2638_v2 = vld [vmem:[%s2284_s30 + $0xe0] sm:$0xff]  ;;  %v227_v33 = vld [vmem:[%s2284_s30 + $0xe8] sm:$0x3] }
  0x96   : > { %v357_v37 = vrot.slane %v2638_v2, 1 }
  0x97   : > { %627 = vrot.lane.b32.xlu0 %v555_v20, %s2200_s5  ;;  %v564_v20 = vrot.slane %v224_v13, 2 }
  0x98   : > { %441 = vrot.lane.b32.xlu1 %v375_v23, %s2199_s4  ;;  %651 = vrot.lane.b32.xlu2 %v585_v29, %s2200_s5  ;;  %v355_v29 = vsel %vm310_vm0, %v352_v62, %v354_v12  ;;  %v569_v12 = vrot.slane %v227_v33, 2 }
  0x99   : > { %v610_v35 = vpop.permute.xlu0 %609  ;;  %v565_v1 = vsel %vm520_vm1, %v562_v7, %v564_v20  ;;  %v572_v7 = vrot.slane %v2660_v53, 2 }
  0x9a   : > { %v396_v38 = vpop.permute.xlu1 %395  ;;  %v2571_v39 = vsel %vm697_vm3, %v492_v34, %v610_v35  ;;  %v608_v0 = vpop.permute.xlu2 %607  ;;  %v566_v34 = vrot.slane %v2635_v61, 2  ;;  %v567_v35 = vrot.slane %v2638_v2, 2 }
  0x9b   : > { %2010 = vmatmul.msk.f32.vlgmr.msra.gmra.mxu2 %vm759_vm4, %v2571_v39  ;;  %v490_v56 = vsel %vm487_vm2, %v2310_v11, %v396_v38  ;;  %v2617_v19 = vsel %vm697_vm3, %v491_v8, %v608_v0  ;;  %v359_v38 = vrot.slane %v227_v33, 1 }
  0x9c   : > { %v568_v0 = vsel %vm520_vm1, %v566_v34, %v567_v35 }
  0x9d   : > { %v360_v43 = vsel %vm310_vm0, %v357_v37, %v359_v38  ;;  %v233_v38 = vld [vmem:[%s2284_s30 + $0x118] sm:$0x3] }
  0x9f   : > { %419 = vrot.lane.b32.xlu0 %v348_v40, %s2199_s4 }
  0xa0   : > { %629 = vrot.lane.b32.xlu1 %v558_v42, %s2200_s5  ;;  %421 = vrot.lane.b32.xlu2 %v350_v52, %s2199_s4  ;;  %v2657_v52 = vld [vmem:[%s2284_s30 + $0xf0] sm:$0xff] }
  0xa1   : > { %v606_v57 = vpop.permute.xlu0 %605 }
  0xa2   : > { %v654_v3 = vpop.permute.xlu1 %653  ;;  %v2596_v4 = vsel %vm697_vm3, %v490_v56, %v606_v57  ;;  %v614_v14 = vpop.permute.xlu2 %613  ;;  %v356_v56 = vrot.slane %v2635_v61, 1  ;;  %v361_v57 = vrot.slane %v2657_v52, 1 }
  0xa3   : > { %1946 = vmatmul.msk.f32.vlgmr.msra.gmra.mxu0 %vm759_vm4, %v2596_v4  ;;  %v2601_v11 = vsel %vm697_vm3, %v514_v63, %v654_v3 }
  0xa4   : > { %1970 = vmatmul.msk.f32.vlgmr.msra.gmra.mxu3 %vm759_vm4, %v2601_v11  ;;  %v363_v13 = vsel %vm310_vm0, %v361_v57, %v362_v58 }
  0xa5   : > { %2054 = vmatpush.msra.mxu3 %v2475_v15 }
  0xa7   : > { %631 = vrot.lane.b32.xlu0 %v560_v6, %s2200_s5  ;;  %2055 = vmatpush.msra.mxu3 %v2484_v18  ;;  %v571_v6 = vrot.slane %v2657_v52, 2 }
  0xa8   : > { %423 = vrot.lane.b32.xlu1 %v353_v25, %s2199_s4  ;;  %633 = vrot.lane.b32.xlu2 %v563_v16, %s2200_s5 }
  0xa9   : > { %v612_v15 = vpop.permute.xlu0 %611  ;;  %2056 = vmatpush.msra.mxu3 %v2492_v24  ;;  %v573_v16 = vsel %vm520_vm1, %v571_v6, %v572_v7 }
  0xaa   : > { %v394_v23 = vpop.permute.xlu1 %393  ;;  %v2626_v18 = vsel %vm697_vm3, %v493_v17, %v612_v15  ;;  %v2642_v24 = vpop.permute.xlu2 %405  ;;  %v2693_v17 = vld [vmem:[%s2284_s30 + $0x108] sm:$0xff]  ;;  %v2696_v15 = vld [vmem:[%s2284_s30 + $0x110] sm:$0xff] }
  0xab   : > { %1947 = vmatmul.msk.f32.gmra.mxu0 %vm759_vm4, %v2617_v19  ;;  %2011 = vmatmul.msk.f32.gmra.mxu2 %vm759_vm4, %v2626_v18  ;;  %v489_v40 = vsel %vm487_vm2, %v2298_v5, %v394_v23  ;;  %v358_v5 = vsel %vm310_vm0, %v356_v56, %v357_v37  ;;  %v366_v23 = vrot.slane %v2693_v17, 1 }
  0xaf   : > { %425 = vrot.lane.b32.xlu0 %v355_v29, %s2199_s4  ;;  %v367_v29 = vrot.slane %v2696_v15, 1 }
  0xb0   : > { %635 = vrot.lane.b32.xlu1 %v565_v1, %s2200_s5  ;;  %427 = vrot.lane.b32.xlu2 %v358_v5, %s2199_s4 }
  0xb1   : > { %v446_v36 = vpop.permute.xlu0 %445  ;;  %v368_v37 = vsel %vm310_vm0, %v366_v23, %v367_v29 }
  0xb2   : > { %v604_v41 = vpop.permute.xlu1 %603  ;;  %v515_v62 = vsel %vm487_vm2, %v2306_v9, %v446_v36  ;;  %v660_v3 = vpop.permute.xlu2 %659 }
  0xb3   : > { %1948 = vmatmul.msk.f32.gmra.mxu0 %vm759_vm4, %v2571_v39  ;;  %v699_v42 = vsel %vm697_vm3, %v489_v40, %v604_v41  ;;  %v495_v40 = vsel %vm487_vm2, %v2360_v50, %v2642_v24 }
  0xb4   : > { %1979 = vmatmul.msk.f32.gmra.mxu1 %vm759_vm4, %v699_v42  ;;  %v579_v42 = vrot.slane %v233_v38, 2 }
  0xb7   : > { %637 = vrot.lane.b32.xlu0 %v568_v0, %s2200_s5 }
  0xb8   : > { %429 = vrot.lane.b32.xlu1 %v360_v43, %s2199_s4 }
  0xb9   : > { %v656_v63 = vpop.permute.xlu0 %655 }
  0xba   : > { %v404_v10 = vpop.permute.xlu1 %403  ;;  %v2674_v8 = vsel %vm697_vm3, %v515_v62, %v656_v63 }
  0xbb   : > { %v494_v25 = vsel %vm487_vm2, %v2357_v49, %v404_v10  ;;  %1949 = vmatmul.msk.f32.gmra.mxu0 %vm759_vm4, %v2626_v18  ;;  %1971 = vmatmul.msk.f32.gmra.mxu3 %vm759_vm4, %v2674_v8  ;;  %v230_v49 = vld [vmem:[%s2284_s30 + $0x100] sm:$0x3] }
  0xbc   : > { %1980 = vmatmul.msk.f32.gmra.mxu1 %vm759_vm4, %v2596_v4  ;;  %v2685_v9 = vsel %vm697_vm3, %v494_v25, %v614_v14  ;;  %v570_v4 = vsel %vm520_vm1, %v567_v35, %v569_v12  ;;  %v574_v14 = vrot.slane %v230_v49, 2  ;;  %v452_v35 = vpop.permute.xlu2 %451  ;;  %v364_v62 = vrot.slane %v230_v49, 1  ;;  %v2770_v12 = vld [vmem:[%s2284_s30 + $0x1a0] sm:$0xff] }
  0xbd   : > { %2012 = vmatmul.msk.f32.gmra.mxu2 %vm759_vm4, %v2685_v9  ;;  %639 = vrot.lane.b32.xlu2 %v570_v4, %s2200_s5 }
  0xbe   : > { %v575_v36 = vsel %vm520_vm1, %v572_v7, %v574_v14 }
  0xbf   : > { %431 = vrot.lane.b32.xlu0 %v363_v13, %s2199_s4 }
  0xc0   : > { %641 = vrot.lane.b32.xlu1 %v573_v16, %s2200_s5 }
  0xc1   : > { %v448_v20 = vpop.permute.xlu0 %447 }
  0xc2   : > { %v516_v1 = vsel %vm487_vm2, %v2373_v59, %v448_v20  ;;  %v658_v33 = vpop.permute.xlu1 %657  ;;  %v369_v59 = vrot.slane %v233_v38, 1 }
  0xc3   : > { %1950 = vmatmul.msk.f32.gmra.mxu0 %vm759_vm4, %v2685_v9  ;;  %v2709_v34 = vsel %vm697_vm3, %v516_v1, %v658_v33  ;;  %v251_v33 = vld [vmem:[%s2284_s30 + $0x1a8] sm:$0x3] }
  0xc4   : > { %1981 = vmatmul.msk.f32.gmra.mxu1 %vm759_vm4, %v2617_v19  ;;  %1972 = vmatmul.msk.f32.gmra.mxu3 %vm759_vm4, %v2709_v34  ;;  %v577_v19 = vrot.slane %v2696_v15, 2  ;;  %v370_v50 = vsel %vm310_vm0, %v367_v29, %v369_v59  ;;  %v620_v24 = vpop.permute.xlu2 %619 }
  0xc6   : > { %v580_v57 = vsel %vm520_vm1, %v577_v19, %v579_v42 }
  0xc7   : > { %643 = vrot.lane.b32.xlu0 %v575_v36, %s2200_s5  ;;  %v1094_v36 = vrot.slane %v251_v33, 1 }
  0xc8   : > { %435 = vrot.lane.b32.xlu1 %v368_v37, %s2199_s4 }
  0xc9   : > { %v616_v41 = vpop.permute.xlu0 %615 }
  0xca   : > { %v450_v0 = vpop.permute.xlu1 %449  ;;  %v705_v43 = vsel %vm697_vm3, %v495_v40, %v616_v41 }
  0xcb   : > { %v517_v56 = vsel %vm487_vm2, %v2376_v60, %v450_v0  ;;  %1951 = vmatmul.msk.f32.gmra.mxu0 %vm759_vm4, %v705_v43  ;;  %2013 = vmatmul.msk.f32.gmra.mxu2 %vm759_vm4, %v705_v43  ;;  %v365_v60 = vsel %vm310_vm0, %v362_v58, %v364_v62  ;;  %v576_v58 = vrot.slane %v2693_v17, 2 }
  0xcc   : > { %1982 = vmatmul.msk.f32.gmra.mxu1 %vm759_vm4, %v2571_v39  ;;  %v2732_v5 = vsel %vm697_vm3, %v517_v56, %v660_v3  ;;  %433 = vrot.lane.b32.xlu2 %v365_v60, %s2199_s4  ;;  %v412_v7 = vpop.permute.xlu2 %411 }
  0xcd   : > { %1973 = vmatmul.msk.f32.gmra.mxu3 %vm759_vm4, %v2732_v5  ;;  %v578_v10 = vsel %vm520_vm1, %v576_v58, %v577_v19 }
  0xcf   : > { %437 = vrot.lane.b32.xlu0 %v370_v50, %s2199_s4 }
  0xd0   : > { %647 = vrot.lane.b32.xlu1 %v580_v57, %s2200_s5 }
  0xd1   : > { %v408_v39 = vpop.permute.xlu0 %407 }
  0xd2   : > { %v496_v63 = vsel %vm487_vm2, %v2397_v21, %v408_v39  ;;  %v618_v3 = vpop.permute.xlu1 %617  ;;  %v518_v21 = vsel %vm487_vm2, %v2410_v28, %v452_v35  ;;  %v2767_v28 = vld [vmem:[%s2284_s30 + $0x198] sm:$0xff]  ;;  %v1092_v35 = vrot.slane %v2770_v12, 1 }
  0xd3   : > { %v706_v6 = vsel %vm697_vm3, %v496_v63, %v618_v3  ;;  %v1104_v4 = vrot.slane %v2767_v28, 2  ;;  %v1091_v50 = vrot.slane %v2767_v28, 1 }
  0xd4   : > { %1983 = vmatmul.msk.f32.gmra.mxu1 %vm759_vm4, %v2626_v18  ;;  %1952 = vmatmul.msk.f32.gmra.mxu0 %vm759_vm4, %v706_v6  ;;  %v752_v23 = vpop.permute.xlu2 %751  ;;  %v1095_v37 = vsel %vm310_vm0, %v1092_v35, %v1094_v36 }
  0xd5   : > { %2014 = vmatmul.msk.f32.gmra.mxu2 %vm759_vm4, %v706_v6  ;;  %645 = vrot.lane.b32.xlu2 %v578_v10, %s2200_s5 }
  0xd8   : > { %1098 = vrot.lane.b32.xlu1 %v1095_v37, %s2199_s4 }
  0xd9   : > { %v662_v25 = vpop.permute.xlu0 %661 }
  0xda   : > { %v410_v13 = vpop.permute.xlu1 %409  ;;  %v2755_v18 = vsel %vm697_vm3, %v518_v21, %v662_v25 }
  0xdb   : > { %v497_v16 = vsel %vm487_vm2, %v2400_v22, %v410_v13  ;;  %1974 = vmatmul.msk.f32.gmra.mxu3 %vm759_vm4, %v2755_v18  ;;  %v1105_v22 = vrot.slane %v2770_v12, 2 }
  0xdc   : > { %1984 = vmatmul.msk.f32.gmra.mxu1 %vm759_vm4, %v2685_v9  ;;  %v707_v49 = vsel %vm697_vm3, %v497_v16, %v620_v24  ;;  %v741_v19 = vpop.permute.xlu2 %740  ;;  %v1093_v24 = vsel %vm310_vm0, %v1091_v50, %v1092_v35 }
  0xdd   : > { %2015 = vmatmul.msk.f32.gmra.mxu2 %vm759_vm4, %v707_v49  ;;  %1953 = vmatmul.msk.f32.gmra.mxu0 %vm759_vm4, %v707_v49  ;;  %v1106_v14 = vsel %vm520_vm1, %v1104_v4, %v1105_v22  ;;  %v745_v57 = vsel %vm487_vm2, %v2448_v55, %v741_v19  ;;  %v1107_v55 = vrot.slane %v251_v33, 2 }
  0xde   : > { %1109 = vrot.lane.b32.xlu0 %v1106_v14, %s2200_s5  ;;  %1096 = vrot.lane.b32.xlu2 %v1093_v24, %s2199_s4 }
  0xe1   : > { %v454_v20 = vpop.permute.xlu0 %453 }
  0xe2   : > { %v519_v9 = vsel %vm487_vm2, %v2415_v30, %v454_v20  ;;  %v664_v29 = vpop.permute.xlu1 %663  ;;  %v498_v30 = vsel %vm487_vm2, %v2434_v46, %v412_v7 }
  0xe3   : > { %v2779_v1 = vsel %vm697_vm3, %v519_v9, %v664_v29 }
  0xe4   : > { %1985 = vmatmul.msk.f32.gmra.mxu1 %vm759_vm4, %v705_v43  ;;  %1975 = vmatmul.msk.f32.gmra.mxu3 %vm759_vm4, %v2779_v1  ;;  %v626_v56 = vpop.permute.xlu2 %625 }
  0xe9   : > { %v622_v38 = vpop.permute.xlu0 %621 }
  0xea   : > { %v739_v59 = vpop.permute.xlu1 %738  ;;  %v708_v40 = vsel %vm697_vm3, %v498_v30, %v622_v38 }
  0xeb   : > { %v744_v41 = vsel %vm487_vm2, %v2445_v54, %v739_v59  ;;  %1954 = vmatmul.msk.f32.gmra.mxu0 %vm759_vm4, %v708_v40  ;;  %2016 = vmatmul.msk.f32.gmra.mxu2 %vm759_vm4, %v708_v40 }
  0xec   : > { %1986 = vmatmul.msk.f32.gmra.mxu1 %vm759_vm4, %v706_v6  ;;  %v2797_v42 = vsel %vm697_vm3, %v744_v41, %v752_v23  ;;  %v418_v3 = vpop.permute.xlu2 %417  ;;  %v1108_v6 = vsel %vm520_vm1, %v1105_v22, %v1107_v55  ;;  %v2892_v55 = vld [vmem:[%s3727_s2] ss:$0 sm:$0xff] }
  0xed   : > { %1976 = vmatmul.msk.f32.gmra.mxu3 %vm759_vm4, %v2797_v42  ;;  %1111 = vrot.lane.b32.xlu2 %v1108_v6, %s2200_s5  ;;  %v501_v21 = vsel %vm487_vm2, %v2506_v32, %v418_v3 }
  0xf1   : > { %v414_v46 = vpop.permute.xlu0 %413 }
  0xf2   : > { %v499_v0 = vsel %vm487_vm2, %v2439_v48, %v414_v46  ;;  %v624_v43 = vpop.permute.xlu1 %623 }
  0xf3   : > { %v709_v54 = vsel %vm697_vm3, %v499_v0, %v624_v43 }
  0xf4   : > { %1987 = vmatmul.msk.f32.gmra.mxu1 %vm759_vm4, %v707_v49  ;;  %1955 = vmatmul.msk.f32.gmra.mxu0 %vm759_vm4, %v709_v54  ;;  %v652_v13 = vpop.permute.xlu2 %651 }
  0xf5   : > { %2017 = vmatmul.msk.f32.gmra.mxu2 %vm759_vm4, %v709_v54 }
  0xf9   : > { %v754_v48 = vpop.permute.xlu0 %753 }
  0xfa   : > { %v416_v62 = vpop.permute.xlu1 %415  ;;  %v2813_v60 = vsel %vm697_vm3, %v745_v57, %v754_v48 }
  0xfb   : > { %v500_v39 = vsel %vm487_vm2, %v2503_v31, %v416_v62  ;;  %1977 = vmatmul.msk.f32.gmra.mxu3 %vm759_vm4, %v2813_v60 }
  0xfc   : > { %1988 = vmatmul.msk.f32.gmra.mxu1 %vm759_vm4, %v708_v40  ;;  %v710_v63 = vsel %vm697_vm3, %v500_v39, %v626_v56 }
  0xfd   : > { %1956 = vmatmul.msk.f32.gmra.mxu0 %vm759_vm4, %v710_v63  ;;  %2018 = vmatmul.msk.f32.gmra.mxu2 %vm759_vm4, %v710_v63 }
 0x101   : > { %v440_v58 = vpop.permute.xlu0 %439 }
 0x102   : > { %v512_v31 = vsel %vm487_vm2, %v2525_v44, %v440_v58  ;;  %v650_v7 = vpop.permute.xlu1 %649 }
 0x103   : > { %v2828_v10 = vsel %vm697_vm3, %v512_v31, %v650_v7 }
 0x104   : > { %1989 = vmatmul.msk.f32.gmra.mxu1 %vm759_vm4, %v709_v54  ;;  %2002 = vmatmul.msk.f32.vlgmr.msrb.gmra.mxu3 %vm759_vm4, %v2828_v10 }
 0x109   : > { %v628_v25 = vpop.permute.xlu0 %627 }
 0x10a   : > { %v442_v16 = vpop.permute.xlu1 %441  ;;  %v711_v49 = vsel %vm697_vm3, %v501_v21, %v628_v25 }
 0x10b   : > { %v513_v44 = vsel %vm487_vm2, %v2528_v45, %v442_v16  ;;  %1957 = vmatmul.msk.f32.gmra.mxu0 %vm759_vm4, %v711_v49  ;;  %2019 = vmatmul.msk.f32.gmra.mxu2 %vm759_vm4, %v711_v49  ;;  %v422_v45 = vpop.permute.xlu2 %421 }
 0x10c   : > { %1990 = vmatmul.msk.f32.gmra.mxu1 %vm759_vm4, %v710_v63  ;;  %v2842_v4 = vsel %vm697_vm3, %v513_v44, %v652_v13  ;;  %v503_v23 = vsel %vm487_vm2, %v2558_v27, %v422_v45 }
 0x10d   : > { %2003 = vmatmul.msk.f32.gmra.mxu3 %vm759_vm4, %v2842_v4 }
 0x111   : > { %v420_v32 = vpop.permute.xlu0 %419 }
 0x112   : > { %v502_v22 = vsel %vm487_vm2, %v2555_v26, %v420_v32  ;;  %v630_v14 = vpop.permute.xlu1 %629 }
 0x113   : > { %v712_v20 = vsel %vm697_vm3, %v502_v22, %v630_v14  ;;  %v634_v35 = vpop.permute.xlu2 %633 }
 0x114   : > { %1991 = vmatmul.msk.f32.gmra.mxu1 %vm759_vm4, %v711_v49  ;;  %1958 = vmatmul.msk.f32.gmra.mxu0 %vm759_vm4, %v712_v20 }
 0x115   : > { %2004 = vmatmul.msk.f32.gmra.mxu3 %vm759_vm4, %v2601_v11  ;;  %2020 = vmatmul.msk.f32.gmra.mxu2 %vm759_vm4, %v712_v20 }
 0x119   : > { %v632_v9 = vpop.permute.xlu0 %631 }
 0x11a   : > { %v713_v29 = vsel %vm697_vm3, %v503_v23, %v632_v9  ;;  %v424_v26 = vpop.permute.xlu1 %423 }
 0x11b   : > { %v504_v33 = vsel %vm487_vm2, %v2579_v47, %v424_v26  ;;  %v992_v47 = vpop.f32.mrf.mxu1  ;;  %v428_v41 = vpop.permute.xlu2 %427 }
 0x11c   : > { %1992 = vmatmul.msk.f32.gmra.mxu1 %vm759_vm4, %v712_v20  ;;  %1959 = vmatmul.msk.f32.gmra.mxu0 %vm759_vm4, %v713_v29  ;;  %v714_v27 = vsel %vm697_vm3, %v504_v33, %v634_v35  ;;  %v506_v19 = vsel %vm487_vm2, %v2635_v61, %v428_v41 }
 0x11d   : > { %2005 = vmatmul.msk.f32.gmra.mxu3 %vm759_vm4, %v2674_v8  ;;  %2021 = vmatmul.msk.f32.gmra.mxu2 %vm759_vm4, %v713_v29 }
 0x120   : > { %v873_v36 = vpop.f32.mrf.mxu0 }
 0x121   : > { %v426_v37 = vpop.permute.xlu0 %425  ;;  %v993_v24 = vadd.f32 %v992_v47, %v873_v36 }
 0x122   : > { %v505_v30 = vsel %vm487_vm2, %v2582_v51, %v426_v37  ;;  %v636_v38 = vpop.permute.xlu1 %635  ;;  %v1140_v51 = vpop.f32.mrf.mxu2 }
 0x123   : > { %v715_v40 = vsel %vm697_vm3, %v505_v30, %v636_v38  ;;  %v640_v61 = vpop.permute.xlu2 %639  ;;  %v1236_v63 = vadd.f32 %v1140_v51, %v993_v24 }
 0x124   : > { %1993 = vmatmul.msk.f32.gmra.mxu1 %vm759_vm4, %v713_v29  ;;  %1960 = vmatmul.msk.f32.gmra.mxu0 %vm759_vm4, %v714_v27 }
 0x125   : > { %2006 = vmatmul.msk.f32.gmra.mxu3 %vm759_vm4, %v2709_v34  ;;  %2022 = vmatmul.msk.f32.gmra.mxu2 %vm759_vm4, %v714_v27  ;;  %v1271_v31 = vadd.f32 %v2892_v55, %v1236_v63 }
 0x127   : > { %v2908_v22 = vrot.slane %v1271_v31, 1 }
 0x128   : > { %v876_v59 = vpop.f32.mrf.mxu0 }
 0x129   : > { %v638_v46 = vpop.permute.xlu0 %637 }
 0x12a   : > { %v716_v54 = vsel %vm697_vm3, %v506_v19, %v638_v46  ;;  %v430_v56 = vpop.permute.xlu1 %429 }
 0x12b   : > { %v507_v50 = vsel %vm487_vm2, %v2638_v2, %v430_v56  ;;  %v2899_v2 = vpop.f32.mrf.mxu3  ;;  %v434_v32 = vpop.permute.xlu2 %433 }
 0x12c   : > { %1994 = vmatmul.msk.f32.gmra.mxu1 %vm759_vm4, %v714_v27  ;;  %1961 = vmatmul.msk.f32.gmra.mxu0 %vm759_vm4, %v715_v40  ;;  %v717_v39 = vsel %vm697_vm3, %v507_v50, %v640_v61  ;;  %v509_v9 = vsel %vm487_vm2, %v2660_v53, %v434_v32 }
 0x12d   : > { %2007 = vmatmul.msk.f32.gmra.mxu3 %vm759_vm4, %v2732_v5  ;;  %2023 = vmatmul.msk.f32.gmra.mxu2 %vm759_vm4, %v715_v40 }
 0x12e   : > { %v1143_v57 = vpop.f32.mrf.mxu2 }
 0x130   : > { %v879_v0 = vpop.f32.mrf.mxu0 }
 0x131   : > { %v995_v43 = vpop.f32.mrf.mxu1  ;;  %v432_v3 = vpop.permute.xlu0 %431 }
 0x132   : > { %v508_v6 = vsel %vm487_vm2, %v2657_v52, %v432_v3  ;;  %v642_v58 = vpop.permute.xlu1 %641  ;;  %v996_v52 = vadd.f32 %v995_v43, %v876_v59 }
 0x133   : > { %v718_v16 = vsel %vm697_vm3, %v508_v6, %v642_v58  ;;  %v646_v51 = vpop.permute.xlu2 %645 }
 0x134   : > { %1995 = vmatmul.msk.f32.gmra.mxu1 %vm759_vm4, %v715_v40  ;;  %1962 = vmatmul.msk.f32.gmra.mxu0 %vm759_vm4, %v716_v54  ;;  %v1237_v53 = vadd.f32 %v1143_v57, %v996_v52 }
 0x135   : > { %2008 = vmatmul.msk.f32.gmra.mxu3 %vm759_vm4, %v2755_v18  ;;  %2024 = vmatmul.msk.f32.gmra.mxu2 %vm759_vm4, %v716_v54 }
 0x136   : > { %v1272_v47 = vadd.f32 %v2892_v55, %v1237_v53 }
 0x138   : > { %v882_v48 = vpop.f32.mrf.mxu0  ;;  %v1561_v56 = vrot.slane %v1272_v47, 1 }
 0x139   : > { %v998_v62 = vpop.f32.mrf.mxu1  ;;  %v644_v29 = vpop.permute.xlu0 %643 }
 0x13a   : > { %v999_v7 = vadd.f32 %v998_v62, %v879_v0  ;;  %v719_v37 = vsel %vm697_vm3, %v509_v9, %v644_v29  ;;  %v436_v59 = vpop.permute.xlu1 %435 }
 0x13b   : > { %v510_v46 = vsel %vm487_vm2, %v2693_v17, %v436_v59 }
 0x13c   : > { %1996 = vmatmul.msk.f32.gmra.mxu1 %vm759_vm4, %v716_v54  ;;  %1963 = vmatmul.msk.f32.gmra.mxu0 %vm759_vm4, %v717_v39  ;;  %v720_v50 = vsel %vm697_vm3, %v510_v46, %v646_v51 }
 0x13d   : > { %2009 = vmatmul.msk.f32.gmra.mxu3 %vm759_vm4, %v2779_v1  ;;  %2025 = vmatmul.msk.f32.gmra.mxu2 %vm759_vm4, %v717_v39 }
 0x13e   : > { %v2926_v23 = vpop.f32.mrf.mxu3 }
 0x140   : > { %v1146_v21 = vpop.f32.mrf.mxu2  ;;  %v885_v49 = vpop.f32.mrf.mxu0 }
 0x141   : > { %v1238_v25 = vadd.f32 %v1146_v21, %v999_v7  ;;  %v1001_v13 = vpop.f32.mrf.mxu1  ;;  %v438_v17 = vpop.permute.xlu0 %437 }
 0x142   : > { %v1002_v40 = vadd.f32 %v1001_v13, %v882_v48  ;;  %v511_v58 = vsel %vm487_vm2, %v2696_v15, %v438_v17 }
 0x143   : > { %v2906_v44 = vadd.f32 %v2892_v55, %v1238_v25 }
 0x144   : > { %1997 = vmatmul.msk.f32.gmra.mxu1 %vm759_vm4, %v717_v39  ;;  %1964 = vmatmul.msk.f32.gmra.mxu0 %vm759_vm4, %v718_v16 }
 0x145   : > { %2026 = vmatmul.msk.f32.gmra.mxu2 %vm759_vm4, %v718_v16  ;;  %2034 = vmatmul.msk.f32.vlgmr.msra.gmra.mxu3 %vm759_vm4, %v2709_v34  ;;  %v1319_v14 = vrot.slane %v2906_v44, 7  ;;  %v2919_v20 = vsel %vm1326_vm5, %v2906_v44, %v2908_v22  ;;  %v2924_v45 = vsel %vm1332_vm6, %v2906_v44, %v2908_v22  ;;  %v2933_v34 = vsel %vm1320_vm7, %v2906_v44, %v2908_v22 }
 0x146   : > { %v1490_v32 = vsel %vm1338_vm8, %v2906_v44, %v2908_v22 }
 0x147   : > { %v2936_v26 = vsel %vm1338_vm8, %v1319_v14, %v1271_v31  ;;  %v2939_v33 = vsel %vm1326_vm5, %v1319_v14, %v1271_v31  ;;  %v2942_v35 = vsel %vm1332_vm6, %v1319_v14, %v1271_v31  ;;  %v2945_v36 = vsel %vm1320_vm7, %v1319_v14, %v1271_v31  ;;  %v2956_v0 = vpop.f32.mrf.mxu3  ;;  %v648_v31 = vpop.permute.xlu1 %647 }
 0x148   : > { %v888_v38 = vpop.f32.mrf.mxu0 }
 0x149   : > { %v1004_v27 = vpop.f32.mrf.mxu1 }
 0x14a   : > { %v1005_v30 = vadd.f32 %v1004_v27, %v885_v49 }
 0x14c   : > { %1998 = vmatmul.msk.f32.gmra.mxu1 %vm759_vm4, %v718_v16  ;;  %1965 = vmatmul.msk.f32.gmra.mxu0 %vm759_vm4, %v719_v37 }
 0x14d   : > { %2027 = vmatmul.msk.f32.gmra.mxu2 %vm759_vm4, %v719_v37  ;;  %2035 = vmatmul.msk.f32.gmra.mxu3 %vm759_vm4, %v2732_v5 }
 0x14e   : > { %v1149_v41 = vpop.f32.mrf.mxu2 }
 0x14f   : > { %v1239_v19 = vadd.f32 %v1149_v41, %v1002_v40 }
 0x150   : > { %v2982_v13 = vpop.f32.mrf.mxu3 }
 0x151   : > { %v1274_v43 = vadd.f32 %v2892_v55, %v1239_v19  ;;  %v1007_v54 = vpop.f32.mrf.mxu1  ;;  %v891_v62 = vpop.f32.mrf.mxu0 }
 0x152   : > { %v1008_v14 = vadd.f32 %v1007_v54, %v888_v38  ;;  %v1110_v54 = vpop.permute.xlu0 %1109 }
 0x153   : > { %v1695_v61 = vsel %vm1338_vm8, %v1274_v43, %v1561_v56  ;;  %v1562_v24 = vsel %vm1320_vm7, %v1274_v43, %v1561_v56  ;;  %v2963_v5 = vsel %vm1326_vm5, %v1274_v43, %v1561_v56  ;;  %v2966_v57 = vsel %vm1332_vm6, %v1274_v43, %v1561_v56 }
 0x154   : > { %1999 = vmatmul.msk.f32.gmra.mxu1 %vm759_vm4, %v719_v37  ;;  %1708 = vrot.lane.b32.xlu0 %v1695_v61, %s2199_s4  ;;  %v1531_v48 = vrot.slane %v1274_v43, 7 }
 0x155   : > { %1966 = vmatmul.msk.f32.gmra.mxu0 %vm759_vm4, %v720_v50  ;;  %2028 = vmatmul.msk.f32.gmra.mxu2 %vm759_vm4, %v720_v50 }
 0x156   : > { %2036 = vmatmul.msk.f32.gmra.mxu3 %vm759_vm4, %v2755_v18  ;;  %v2975_v39 = vsel %vm1338_vm8, %v1531_v48, %v1272_v47  ;;  %v1597_v63 = vsel %vm1326_vm5, %v1531_v48, %v1272_v47  ;;  %v1638_v3 = vsel %vm1332_vm6, %v1531_v48, %v1272_v47  ;;  %v1532_v6 = vsel %vm1320_vm7, %v1531_v48, %v1272_v47 }
 0x157   : > { %v721_v18 = vsel %vm697_vm3, %v511_v58, %v648_v31 }
 0x158   : > { %v1152_v7 = vpop.f32.mrf.mxu2 }
 0x159   : > { %v1240_v21 = vadd.f32 %v1152_v7, %v1005_v30  ;;  %v1010_v25 = vpop.f32.mrf.mxu1 }
 0x15a   : > { %v1011_v16 = vadd.f32 %v1010_v25, %v891_v62  ;;  %v894_v53 = vpop.f32.mrf.mxu0 }
 0x15b   : > { %v1275_v49 = vadd.f32 %v2892_v55, %v1240_v21 }
 0x15c   : > { %2000 = vmatmul.msk.f32.gmra.mxu1 %vm759_vm4, %v720_v50  ;;  %1503 = vrot.lane.b32.xlu0 %v1490_v32, %s2199_s4 }
 0x15d   : > { %v1322_v15 = vrot.slane %v1275_v49, 6  ;;  %v1358_v52 = vrot.slane %v1275_v49, 7  ;;  %1967 = vmatmul.msk.f32.gmra.mxu0 %vm759_vm4, %v721_v18  ;;  %2029 = vmatmul.msk.f32.gmra.mxu2 %vm759_vm4, %v721_v18 }
 0x15e   : > { %2037 = vmatmul.msk.f32.gmra.mxu3 %vm759_vm4, %v2779_v1 }
 0x15f   : > { %v1409_v44 = vsel %vm1329_vm10, %v1358_v52, %v2919_v20  ;;  %v1450_v22 = vsel %vm1335_vm11, %v1358_v52, %v2924_v45  ;;  %v1359_v9 = vsel %vm1323_vm9, %v1358_v52, %v2933_v34  ;;  %v1393_v29 = vsel %vm1329_vm10, %v1322_v15, %v2939_v33  ;;  %v3007_v20 = vpop.f32.mrf.mxu3 }
 0x160   : > { %v1155_v27 = vpop.f32.mrf.mxu2  ;;  %v1434_v37 = vsel %vm1335_vm11, %v1322_v15, %v2942_v35  ;;  %v1324_v1 = vsel %vm1323_vm9, %v1322_v15, %v2945_v36 }
 0x161   : > { %v1241_v30 = vadd.f32 %v1155_v27, %v1008_v14  ;;  %v1013_v38 = vpop.f32.mrf.mxu1 }
 0x163   : > { %v1276_v45 = vadd.f32 %v2892_v55, %v1241_v30 }
 0x164   : > { %2001 = vmatmul.msk.f32.gmra.mxu1 %vm759_vm4, %v721_v18 }
 0x165   : > { %v1533_v34 = vrot.slane %v1276_v45, 6  ;;  %v3011_v59 = vrot.slane %v1276_v45, 7  ;;  %1968 = vmatmul.msk.f32.gmra.mxu0 %vm759_vm4, %v2828_v10  ;;  %2030 = vmatmul.msk.f32.gmra.mxu2 %vm759_vm4, %v2828_v10 }
 0x166   : > { %2038 = vmatmul.msk.f32.gmra.mxu3 %vm759_vm4, %v2797_v42  ;;  %v1097_v42 = vpop.permute.xlu2 %1096 }
 0x167   : > { %v1564_v33 = vsel %vm1323_vm9, %v3011_v59, %v1562_v24  ;;  %v1598_v35 = vsel %vm1329_vm10, %v1533_v34, %v1597_v63  ;;  %v1639_v47 = vsel %vm1335_vm11, %v1533_v34, %v1638_v3  ;;  %v1534_v40 = vsel %vm1323_vm9, %v1533_v34, %v1532_v6  ;;  %v3024_v46 = vpop.f32.mrf.mxu3 }
 0x168   : > { %v897_v36 = vpop.f32.mrf.mxu0  ;;  %v1102_v43 = vsel %vm487_vm2, %v2767_v28, %v1097_v42 }
 0x169   : > { %v1016_v41 = vpop.f32.mrf.mxu1  ;;  %v1115_v48 = vsel %vm697_vm3, %v1102_v43, %v1110_v54 }
 0x16a   : > { %v1017_v19 = vadd.f32 %v1016_v41, %v897_v36 }
 0x16d   : > { %1969 = vmatmul.msk.f32.gmra.mxu0 %vm759_vm4, %v2842_v4  ;;  %2031 = vmatmul.msk.f32.gmra.mxu2 %vm759_vm4, %v2842_v4 }
 0x16e   : > { %2039 = vmatmul.msk.f32.gmra.mxu3 %vm759_vm4, %v2813_v60  ;;  %v1158_v10 = vpop.f32.mrf.mxu2  ;;  %v1099_v60 = vpop.permute.xlu1 %1098 }
 0x16f   : > { %v1242_v51 = vadd.f32 %v1158_v10, %v1011_v16  ;;  %v1103_v25 = vsel %vm487_vm2, %v2770_v12, %v1099_v60  ;;  %v1112_v16 = vpop.permute.xlu2 %1111 }
 0x170   : > { %v3044_v3 = vpop.f32.mrf.mxu3  ;;  %v1116_v14 = vsel %vm697_vm3, %v1103_v25, %v1112_v16 }
 0x171   : > { %v1277_v56 = vadd.f32 %v2892_v55, %v1242_v51  ;;  %v1019_v50 = vpop.f32.mrf.mxu1  ;;  %v900_v61 = vpop.f32.mrf.mxu0 }
 0x173   : > { %v1325_v24 = vrot.slane %v1277_v56, 5  ;;  %v1360_v17 = vrot.slane %v1277_v56, 6 }
 0x175   : > { %v1475_v4 = vsel %vm1320_vm7, %v1325_v24, %v1322_v15  ;;  %v1491_v62 = vsel %vm1320_vm7, %v1360_v17, %v1358_v52  ;;  %2032 = vmatmul.msk.f32.gmra.mxu2 %vm759_vm4, %v2601_v11  ;;  %v1410_v63 = vsel %vm1332_vm6, %v1360_v17, %v1409_v44  ;;  %v3042_v28 = vsel %vm1338_vm8, %v1360_v17, %v1450_v22 }
 0x176   : > { %2040 = vmatmul.msk.f32.gmra.mxu3 %vm759_vm4, %v1115_v48  ;;  %v1361_v6 = vsel %vm1326_vm5, %v1360_v17, %v1359_v9  ;;  %v1394_v58 = vsel %vm1332_vm6, %v1325_v24, %v1393_v29  ;;  %v3050_v31 = vsel %vm1338_vm8, %v1325_v24, %v1434_v37  ;;  %v1327_v7 = vsel %vm1326_vm5, %v1325_v24, %v1324_v1 }
 0x177   : > { %3731 = vst [vmem:[#allocation5_spill] sm:$0xff] %v3050_v31  ;;  %v1014_v11 = vadd.f32 %v1013_v38, %v894_v53 }
 0x178   : > { %v1161_v21 = vpop.f32.mrf.mxu2 }
 0x179   : > { %v1243_v18 = vadd.f32 %v1161_v21, %v1014_v11  ;;  %v1022_v49 = vpop.f32.mrf.mxu1 }
 0x17a   : > { %v903_v32 = vpop.f32.mrf.mxu0 }
 0x17b   : > { %v1278_v15 = vadd.f32 %v2892_v55, %v1243_v18  ;;  %v1023_v52 = vadd.f32 %v1022_v49, %v903_v32 }
 0x17d   : > { %v1535_v44 = vrot.slane %v1278_v15, 5  ;;  %v3057_v22 = vrot.slane %v1278_v15, 6  ;;  %2033 = vmatmul.msk.f32.gmra.mxu2 %vm759_vm4, %v2674_v8 }
 0x17e   : > { %2041 = vmatmul.msk.f32.gmra.mxu3 %vm759_vm4, %v1116_v14  ;;  %v3062_v9 = vpop.f32.mrf.mxu3 }
 0x17f   : > { %v1680_v12 = vsel %vm1320_vm7, %v1535_v44, %v1533_v34  ;;  %v1599_v53 = vsel %vm1332_vm6, %v1535_v44, %v1598_v35  ;;  %v3067_v27 = vsel %vm1338_vm8, %v1535_v44, %v1639_v47  ;;  %v1566_v37 = vsel %vm1326_vm5, %v3057_v22, %v1564_v33 }
 0x180   : > { %v1164_v29 = vpop.f32.mrf.mxu2  ;;  %v1536_v1 = vsel %vm1326_vm5, %v1535_v44, %v1534_v40 }
 0x181   : > { %v1244_v30 = vadd.f32 %v1164_v29, %v1017_v19  ;;  %v1025_v36 = vpop.f32.mrf.mxu1  ;;  %v1020_v19 = vadd.f32 %v1019_v50, %v900_v61 }
 0x183   : > { %v1279_v8 = vadd.f32 %v2892_v55, %v1244_v30 }
 0x185   : > { %v1328_v38 = vrot.slane %v1279_v8, 4  ;;  %v1362_v45 = vrot.slane %v1279_v8, 5 }
 0x187   : > { %v1476_v41 = vsel %vm1323_vm9, %v1328_v38, %v1475_v4  ;;  %v1492_v34 = vsel %vm1323_vm9, %v1362_v45, %v1491_v62  ;;  %v3075_v42 = vpop.f32.mrf.mxu3  ;;  %v1411_v35 = vsel %vm1335_vm11, %v1362_v45, %v1410_v63  ;;  %v1363_v47 = vsel %vm1329_vm10, %v1362_v45, %v1361_v6 }
 0x188   : > { %v906_v10 = vpop.f32.mrf.mxu0  ;;  %v1395_v33 = vsel %vm1335_vm11, %v1328_v38, %v1394_v58  ;;  %v1330_v40 = vsel %vm1329_vm10, %v1328_v38, %v1327_v7 }
 0x189   : > { %v1028_v43 = vpop.f32.mrf.mxu1  ;;  %v1026_v18 = vadd.f32 %v1025_v36, %v906_v10 }
 0x18e   : > { %v1167_v51 = vpop.f32.mrf.mxu2 }
 0x18f   : > { %v1245_v54 = vadd.f32 %v1167_v51, %v1020_v19 }
 0x190   : > { %v3081_v56 = vpop.f32.mrf.mxu3 }
 0x191   : > { %v1280_v24 = vadd.f32 %v2892_v55, %v1245_v54  ;;  %v909_v17 = vpop.f32.mrf.mxu0  ;;  %v1031_v58 = vpop.f32.mrf.mxu1 }
 0x193   : > { %v1537_v48 = vrot.slane %v1280_v24, 4  ;;  %v3084_v4 = vrot.slane %v1280_v24, 5 }
 0x195   : > { %v1681_v62 = vsel %vm1323_vm9, %v1537_v48, %v1680_v12  ;;  %v1600_v60 = vsel %vm1335_vm11, %v1537_v48, %v1599_v53  ;;  %v1568_v63 = vsel %vm1329_vm10, %v3084_v4, %v1566_v37  ;;  %v1538_v50 = vsel %vm1329_vm10, %v1537_v48, %v1536_v1 }
 0x198   : > { %v3091_v61 = vpop.f32.mrf.mxu3  ;;  %v1170_v6 = vpop.f32.mrf.mxu2 }
 0x199   : > { %v1246_v7 = vadd.f32 %v1170_v6, %v1023_v52  ;;  %v912_v11 = vpop.f32.mrf.mxu0  ;;  %v1034_v8 = vpop.f32.mrf.mxu1 }
 0x19b   : > { %v1281_v21 = vadd.f32 %v2892_v55, %v1246_v7 }
 0x19d   : > { %v1331_v25 = vrot.slane %v1281_v21, 3  ;;  %v1364_v16 = vrot.slane %v1281_v21, 4 }
 0x19f   : > { %v1436_v49 = vsel %vm1320_vm7, %v1331_v25, %v1328_v38  ;;  %v1452_v32 = vsel %vm1320_vm7, %v1364_v16, %v1362_v45  ;;  %v1477_v15 = vsel %vm1326_vm5, %v1331_v25, %v1476_v41  ;;  %v3098_v14 = vsel %vm1326_vm5, %v1364_v16, %v1492_v34 }
 0x1a0   : > { %v3100_v44 = vpop.f32.mrf.mxu3  ;;  %v1173_v12 = vpop.f32.mrf.mxu2  ;;  %v3103_v52 = vsel %vm1338_vm8, %v1364_v16, %v1411_v35  ;;  %v1365_v29 = vsel %vm1332_vm6, %v1364_v16, %v1363_v47  ;;  %v3107_v53 = vsel %vm1338_vm8, %v1331_v25, %v1395_v33  ;;  %v1333_v37 = vsel %vm1332_vm6, %v1331_v25, %v1330_v40 }
 0x1a1   : > { %v1247_v1 = vadd.f32 %v1173_v12, %v1026_v18  ;;  %v915_v30 = vpop.f32.mrf.mxu0  ;;  %v1614_v45 = vsel %vm1329_vm10, %v3011_v59, %v2963_v5  ;;  %v1029_v35 = vadd.f32 %v1028_v43, %v909_v17  ;;  %v1037_v6 = vpop.f32.mrf.mxu1  ;;  %v1655_v25 = vsel %vm1335_vm11, %v3011_v59, %v2966_v57 }
 0x1a2   : > { %v1615_v34 = vsel %vm1332_vm6, %v3057_v22, %v1614_v45  ;;  %v1032_v16 = vadd.f32 %v1031_v58, %v912_v11 }
 0x1a3   : > { %v1282_v38 = vadd.f32 %v2892_v55, %v1247_v1  ;;  %v1616_v47 = vsel %vm1335_vm11, %v3084_v4, %v1615_v34 }
 0x1a5   : > { %v1539_v36 = vrot.slane %v1282_v38, 3  ;;  %v3114_v41 = vrot.slane %v1282_v38, 4 }
 0x1a7   : > { %v1641_v10 = vsel %vm1320_vm7, %v1539_v36, %v1537_v48  ;;  %v3124_v33 = vsel %vm1320_vm7, %v3114_v41, %v3084_v4  ;;  %v1682_v40 = vsel %vm1326_vm5, %v1539_v36, %v1681_v62  ;;  %v1617_v5 = vsel %vm1338_vm8, %v3114_v41, %v1616_v47 }
 0x1a8   : > { %v3129_v19 = vpop.f32.mrf.mxu3  ;;  %1626 = vrot.lane.b32.xlu0 %v1617_v5, %s2199_s4  ;;  %v1176_v51 = vpop.f32.mrf.mxu2  ;;  %v3133_v43 = vsel %vm1338_vm8, %v1539_v36, %v1600_v60  ;;  %v1570_v54 = vsel %vm1332_vm6, %v3114_v41, %v1568_v63  ;;  %v1540_v24 = vsel %vm1332_vm6, %v1539_v36, %v1538_v50  ;;  %v1656_v60 = vsel %vm1338_vm8, %v3057_v22, %v1655_v25 }
 0x1a9   : > { %v1248_v17 = vadd.f32 %v1176_v51, %v1029_v35  ;;  %v918_v62 = vpop.f32.mrf.mxu0  ;;  %v1040_v34 = vpop.f32.mrf.mxu1 }
 0x1ab   : > { %v1283_v48 = vadd.f32 %v2892_v55, %v1248_v17 }
 0x1ad   : > { %v1334_v7 = vrot.slane %v1283_v48, 2  ;;  %v3139_v21 = vrot.slane %v1283_v48, 3 }
 0x1af   : > { %v1437_v63 = vsel %vm1323_vm9, %v1334_v7, %v1436_v49  ;;  %v1453_v50 = vsel %vm1323_vm9, %v3139_v21, %v1452_v32  ;;  %v1478_v18 = vsel %vm1329_vm10, %v1334_v7, %v1477_v15  ;;  %v1367_v38 = vsel %vm1335_vm11, %v3139_v21, %v1365_v29 }
 0x1b0   : > { %v3150_v12 = vpop.f32.mrf.mxu3  ;;  %1667 = vrot.lane.b32.xlu0 %v1656_v60, %s2199_s4  ;;  %v1179_v1 = vpop.f32.mrf.mxu2  ;;  %v1336_v57 = vsel %vm1335_vm11, %v1334_v7, %v1333_v37  ;;  %v1035_v32 = vadd.f32 %v1034_v8, %v915_v30  ;;  %v1038_v8 = vadd.f32 %v1037_v6, %v918_v62 }
 0x1b1   : > { %v1249_v45 = vadd.f32 %v1179_v1, %v1032_v16  ;;  %v921_v36 = vpop.f32.mrf.mxu0 }
 0x1b3   : > { %v1284_v58 = vadd.f32 %v2892_v55, %v1249_v45 }
 0x1b5   : > { %v1541_v11 = vrot.slane %v1284_v58, 2  ;;  %v3157_v49 = vrot.slane %v1284_v58, 3 }
 0x1b7   : > { %v1642_v15 = vsel %vm1323_vm9, %v1541_v11, %v1641_v10  ;;  %v1683_v35 = vsel %vm1329_vm10, %v1541_v11, %v1682_v40  ;;  %v1572_v29 = vsel %vm1335_vm11, %v3157_v49, %v1570_v54  ;;  %v1542_v37 = vsel %vm1335_vm11, %v1541_v11, %v1540_v24 }
 0x1b8   : > { %v1082_v47 = vpop.f32.mrf.mxu3  ;;  %v1182_v5 = vpop.f32.mrf.mxu2 }
 0x1b9   : > { %v3165_v51 = vadd.f32 %v1082_v47, %v3044_v3  ;;  %v1250_v17 = vadd.f32 %v1182_v5, %v1035_v32  ;;  %v924_v60 = vpop.f32.mrf.mxu0  ;;  %v1041_v47 = vadd.f32 %v1040_v34, %v921_v36 }
 0x1bb   : > { %v1285_v48 = vadd.f32 %v2892_v55, %v1250_v17 }
 0x1bd   : > { %v1337_v25 = vrot.slane %v1285_v48, 1  ;;  %v3168_v30 = vrot.slane %v1285_v48, 2 }
 0x1bf   : > { %v1397_v10 = vsel %vm1320_vm7, %v1337_v25, %v1334_v7  ;;  %v1413_v40 = vsel %vm1320_vm7, %v3168_v30, %v3139_v21  ;;  %v1438_v54 = vsel %vm1326_vm5, %v1337_v25, %v1437_v63  ;;  %v1479_v16 = vsel %vm1332_vm6, %v1337_v25, %v1478_v18  ;;  %v1043_v7 = vpop.f32.mrf.mxu1 }
 0x1c0   : > { %v3175_v24 = vpop.f32.mrf.mxu3  ;;  %v1185_v3 = vpop.f32.mrf.mxu2  ;;  %v1454_v1 = vsel %vm1326_vm5, %v3168_v30, %v1453_v50  ;;  %v3182_v62 = vsel %vm1338_vm8, %v3168_v30, %v1367_v38  ;;  %v3185_v6 = vsel %vm1338_vm8, %v1337_v25, %v1336_v57 }
 0x1c1   : > { %3732 = vst [vmem:[#allocation6_spill] sm:$0xff] %v3185_v6  ;;  %v1251_v45 = vadd.f32 %v1185_v3, %v1038_v8  ;;  %v927_v48 = vpop.f32.mrf.mxu0  ;;  %v1044_v3 = vadd.f32 %v1043_v7, %v924_v60 }
 0x1c3   : > { %v1286_v63 = vadd.f32 %v2892_v55, %v1251_v45 }
 0x1c5   : > { %v1543_v58 = vrot.slane %v1286_v63, 1  ;;  %v3188_v32 = vrot.slane %v1286_v63, 2 }
 0x1c7   : > { %v1602_v18 = vsel %vm1320_vm7, %v1543_v58, %v1541_v11  ;;  %v1643_v5 = vsel %vm1326_vm5, %v1543_v58, %v1642_v15  ;;  %v1684_v38 = vsel %vm1332_vm6, %v1543_v58, %v1683_v35  ;;  %v3195_v57 = vsel %vm1338_vm8, %v3188_v32, %v1572_v29  ;;  %v1046_v8 = vpop.f32.mrf.mxu1 }
 0x1c8   : > { %v1188_v50 = vpop.f32.mrf.mxu2  ;;  %v1212_v17 = vpop.f32.mrf.mxu3  ;;  %v3198_v25 = vsel %vm1338_vm8, %v1543_v58, %v1542_v37 }
 0x1c9   : > { %v1252_v31 = vadd.f32 %v1188_v50, %v1041_v47  ;;  %3733 = vst [vmem:[#allocation7_spill] sm:$0xff] %v3198_v25 }
 0x1cb   : > { %v1287_v36 = vadd.f32 %v2892_v55, %v1252_v31  ;;  %v1065_v31 = vadd.f32 %v3075_v42, %v2899_v2  ;;  %v1071_v2 = vadd.f32 %v3091_v61, %v2956_v0 }
 0x1cd   : > { %v1398_v11 = vsel %vm1323_vm9, %v1287_v36, %v1397_v10  ;;  %v3202_v34 = vrot.slane %v1287_v36, 1  ;;  %v1480_v15 = vsel %vm1335_vm11, %v1287_v36, %v1479_v16  ;;  %v1439_v35 = vsel %vm1329_vm10, %v1287_v36, %v1438_v54  ;;  %v930_v10 = vpop.f32.mrf.mxu0 }
 0x1ce   : > { %v1260_v16 = vadd.f32 %v1212_v17, %v1065_v31 }
 0x1cf   : > { %v1414_v45 = vsel %vm1323_vm9, %v3202_v34, %v1413_v40  ;;  %v1455_v29 = vsel %vm1329_vm10, %v3202_v34, %v1454_v1  ;;  %v1049_v50 = vpop.f32.mrf.mxu1  ;;  %v1047_v1 = vadd.f32 %v1046_v8, %v927_v48 }
 0x1d0   : > { %v1191_v37 = vpop.f32.mrf.mxu2  ;;  %v1215_v63 = vpop.f32.mrf.mxu3  ;;  %v1295_v42 = vadd.f32 %v2892_v55, %v1260_v16  ;;  %v1050_v61 = vadd.f32 %v1049_v50, %v930_v10 }
 0x1d1   : > { %v1253_v58 = vadd.f32 %v1191_v37, %v1044_v3 }
 0x1d2   : > { %v3236_v0 = vrot.slane %v1295_v42, 4 }
 0x1d3   : > { %v3213_v47 = vadd.f32 %v2892_v55, %v1253_v58 }
 0x1d5   : > { %v1603_v54 = vsel %vm1323_vm9, %v3213_v47, %v1602_v18  ;;  %v1685_v40 = vsel %vm1335_vm11, %v3213_v47, %v1684_v38  ;;  %v3221_v60 = vsel %vm1329_vm10, %v3213_v47, %v1643_v5  ;;  %v1696_v18 = vsel %vm1320_vm7, %v3057_v22, %v3011_v59  ;;  %v933_v31 = vpop.f32.mrf.mxu0 }
 0x1d6   : > { %v1068_v38 = vadd.f32 %v3081_v56, %v2926_v23  ;;  %v1697_v48 = vsel %vm1323_vm9, %v3084_v4, %v1696_v18  ;;  %v3244_v22 = vrot.slane %v1295_v42, 5 }
 0x1d8   : > { %v1194_v7 = vpop.f32.mrf.mxu2  ;;  %v1261_v58 = vadd.f32 %v1215_v63, %v1068_v38  ;;  %v1052_v63 = vpop.f32.mrf.mxu1 }
 0x1d9   : > { %v1254_v3 = vadd.f32 %v1194_v7, %v1047_v1  ;;  %v1218_v17 = vpop.f32.mrf.mxu3  ;;  %v3262_v7 = vrot.slane %v3213_v47, 1 }
 0x1da   : > { %v1262_v37 = vadd.f32 %v1218_v17, %v1071_v2  ;;  %v1074_v2 = vadd.f32 %v3100_v44, %v2982_v13 }
 0x1db   : > { %v3232_v5 = vadd.f32 %v2892_v55, %v1254_v3 }
 0x1dc   : > { %v1297_v8 = vadd.f32 %v2892_v55, %v1262_v37 }
 0x1dd   : > { %v1340_v16 = vrot.slane %v3232_v5, 7  ;;  %v1415_v59 = vsel %vm1326_vm5, %v3232_v5, %v1414_v45  ;;  %v1456_v23 = vsel %vm1332_vm6, %v3232_v5, %v1455_v29  ;;  %v1371_v10 = vsel %vm1320_vm7, %v3232_v5, %v3202_v34 }
 0x1de   : > { %v3246_v56 = vrot.slane %v1297_v8, 3  ;;  %v3248_v4 = vrot.slane %v1297_v8, 4 }
 0x1df   : > { %v3254_v50 = vsel %vm1338_vm8, %v1340_v16, %v1480_v15  ;;  %v1399_v1 = vsel %vm1326_vm5, %v1340_v16, %v1398_v11  ;;  %v1440_v45 = vsel %vm1332_vm6, %v1340_v16, %v1439_v35  ;;  %v1341_v29 = vsel %vm1320_vm7, %v1340_v16, %v1287_v36 }
 0x1e0   : > { %v1197_v42 = vpop.f32.mrf.mxu2  ;;  %v1459_v3 = vsel %vm1320_vm7, %v3248_v4, %v3244_v22  ;;  %v1443_v15 = vsel %vm1320_vm7, %v3246_v56, %v3236_v0  ;;  %v1296_v11 = vadd.f32 %v2892_v55, %v1261_v58  ;;  %v1698_v36 = vsel %vm1326_vm5, %v3114_v41, %v1697_v48 }
 0x1e1   : > { %v1255_v35 = vadd.f32 %v1197_v42, %v1050_v61  ;;  %v1221_v17 = vpop.f32.mrf.mxu3  ;;  %v1699_v44 = vsel %vm1329_vm10, %v3157_v49, %v1698_v36  ;;  %v936_v36 = vpop.f32.mrf.mxu0 }
 0x1e2   : > { %v1263_v13 = vadd.f32 %v1221_v17, %v1074_v2  ;;  %v1700_v18 = vsel %vm1332_vm6, %v3188_v32, %v1699_v44  ;;  %v3283_v61 = vrot.slane %v1296_v11, 4  ;;  %v3290_v58 = vrot.slane %v1296_v11, 5 }
 0x1e3   : > { %v3276_v37 = vadd.f32 %v2892_v55, %v1255_v35  ;;  %v1701_v8 = vsel %vm1335_vm11, %v3262_v7, %v1700_v18  ;;  %v1077_v35 = vadd.f32 %v3129_v19, %v3007_v20  ;;  %v1053_v17 = vadd.f32 %v1052_v63, %v933_v31 }
 0x1e4   : > { %v1298_v38 = vadd.f32 %v2892_v55, %v1263_v13 }
 0x1e5   : > { %v1702_v41 = vsel %vm1338_vm8, %v3276_v37, %v1701_v8  ;;  %v1576_v48 = vsel %vm1320_vm7, %v3276_v37, %v3262_v7  ;;  %v1545_v42 = vrot.slane %v3276_v37, 7  ;;  %v1055_v8 = vpop.f32.mrf.mxu1 }
 0x1e6   : > { %v3292_v16 = vrot.slane %v1298_v38, 3  ;;  %v3294_v2 = vrot.slane %v1298_v38, 4  ;;  %1710 = vrot.lane.b32.xlu1 %v1702_v41, %s2199_s4 }
 0x1e7   : > { %v3304_v11 = vsel %vm1338_vm8, %v1545_v42, %v1685_v40  ;;  %v1604_v18 = vsel %vm1326_vm5, %v1545_v42, %v1603_v54  ;;  %v1645_v20 = vsel %vm1332_vm6, %v1545_v42, %v3221_v60  ;;  %v1546_v19 = vsel %vm1320_vm7, %v1545_v42, %v3213_v47 }
 0x1e8   : > { %v1200_v13 = vpop.f32.mrf.mxu2  ;;  %v1664_v44 = vsel %vm1320_vm7, %v3294_v2, %v3290_v58  ;;  %v1648_v38 = vsel %vm1320_vm7, %v3292_v16, %v3283_v61  ;;  %v1494_v40 = vsel %vm1329_vm10, %v3139_v21, %v3098_v14  ;;  %v1056_v42 = vadd.f32 %v1055_v8, %v936_v36 }
 0x1e9   : > { %v1256_v41 = vadd.f32 %v1200_v13, %v1053_v17  ;;  %v1224_v6 = vpop.f32.mrf.mxu3  ;;  %v1495_v63 = vsel %vm1332_vm6, %v3168_v30, %v1494_v40 }
 0x1ea   : > { %v1264_v31 = vadd.f32 %v1224_v6, %v1077_v35  ;;  %v1496_v17 = vsel %vm1335_vm11, %v3202_v34, %v1495_v63  ;;  %v1080_v6 = vadd.f32 %v3150_v12, %v3024_v46 }
 0x1eb   : > { %v1291_v54 = vadd.f32 %v2892_v55, %v1256_v41  ;;  %v1497_v47 = vsel %vm1338_vm8, %v3232_v5, %v1496_v17 }
 0x1ec   : > { %v1299_v25 = vadd.f32 %v2892_v55, %v1264_v31 }
 0x1ed   : > { %v1342_v13 = vrot.slane %v1291_v54, 6  ;;  %v1372_v60 = vrot.slane %v1291_v54, 7 }
 0x1ee   : > { %v3327_v14 = vrot.slane %v1299_v25, 2  ;;  %v3329_v21 = vrot.slane %v1299_v25, 3  ;;  %1505 = vrot.lane.b32.xlu1 %v1497_v47, %s2199_s4 }
 0x1ef   : > { %v1416_v30 = vsel %vm1329_vm10, %v1372_v60, %v1415_v59  ;;  %v1457_v35 = vsel %vm1335_vm11, %v1372_v60, %v1456_v23  ;;  %v3335_v34 = vsel %vm1329_vm10, %v1342_v13, %v1399_v1  ;;  %v3338_v41 = vsel %vm1323_vm9, %v1372_v60, %v1371_v10  ;;  %v939_v23 = vpop.f32.mrf.mxu0  ;;  %v1058_v10 = vpop.f32.mrf.mxu1 }
 0x1f0   : > { %v1203_v5 = vpop.f32.mrf.mxu2  ;;  %v1460_v46 = vsel %vm1323_vm9, %v3329_v21, %v1459_v3  ;;  %v3344_v12 = vsel %vm1323_vm9, %v3327_v14, %v1443_v15  ;;  %v3347_v25 = vsel %vm1335_vm11, %v1342_v13, %v1440_v45  ;;  %v3350_v59 = vsel %vm1323_vm9, %v1342_v13, %v1341_v29 }
 0x1f1   : > { %v1257_v1 = vadd.f32 %v1203_v5, %v1056_v42  ;;  %v1227_v36 = vpop.f32.mrf.mxu3  ;;  %v1059_v63 = vadd.f32 %v1058_v10, %v939_v23  ;;  %v1086_v10 = vadd.f32 %v3175_v24, %v3062_v9 }
 0x1f2   : > { %v1265_v8 = vadd.f32 %v1227_v36, %v1080_v6 }
 0x1f3   : > { %v1292_v31 = vadd.f32 %v2892_v55, %v1257_v1 }
 0x1f4   : > { %v1300_v40 = vadd.f32 %v2892_v55, %v1265_v8 }
 0x1f5   : > { %v3354_v3 = vrot.slane %v1292_v31, 6  ;;  %v3356_v54 = vrot.slane %v1292_v31, 7 }
 0x1f6   : > { %v3358_v15 = vrot.slane %v1300_v40, 2  ;;  %v3360_v45 = vrot.slane %v1300_v40, 3 }
 0x1f7   : > { %v3364_v29 = vsel %vm1323_vm9, %v3356_v54, %v1576_v48  ;;  %v3368_v17 = vsel %vm1329_vm10, %v3354_v3, %v1604_v18  ;;  %v3380_v5 = vsel %vm1335_vm11, %v3354_v3, %v1645_v20  ;;  %v3384_v48 = vsel %vm1323_vm9, %v3354_v3, %v1546_v19  ;;  %v942_v36 = vpop.f32.mrf.mxu0 }
 0x1f8   : > { %v1206_v47 = vpop.f32.mrf.mxu2  ;;  %v3372_v6 = vsel %vm1323_vm9, %v3360_v45, %v1664_v44  ;;  %v3376_v42 = vsel %vm1323_vm9, %v3358_v15, %v1648_v38  ;;  %v1618_v44 = vsel %vm1320_vm7, %v3188_v32, %v3157_v49  ;;  %v1658_v20 = vsel %vm1323_vm9, %v3157_v49, %v3124_v33 }
 0x1f9   : > { %v1258_v23 = vadd.f32 %v1206_v47, %v1059_v63  ;;  %v1230_v18 = vpop.f32.mrf.mxu3  ;;  %v1619_v19 = vsel %vm1323_vm9, %v3262_v7, %v1618_v44 }
 0x1fa   : > { %v1266_v1 = vadd.f32 %v1230_v18, %v3165_v51  ;;  %v1061_v51 = vpop.f32.mrf.mxu1  ;;  %v1620_v63 = vsel %vm1326_vm5, %v3276_v37, %v1619_v19 }
 0x1fb   : > { %v1293_v38 = vadd.f32 %v2892_v55, %v1258_v23  ;;  %v1062_v47 = vadd.f32 %v1061_v51, %v942_v36  ;;  %v1621_v33 = vsel %vm1329_vm10, %v3356_v54, %v1620_v63 }
 0x1fc   : > { %v1301_v8 = vadd.f32 %v2892_v55, %v1266_v1 }
 0x1fd   : > { %v3399_v31 = vrot.slane %v1293_v38, 5  ;;  %v1374_v40 = vrot.slane %v1293_v38, 6 }
 0x1fe   : > { %v3403_v23 = vrot.slane %v1301_v8, 1  ;;  %v3405_v18 = vrot.slane %v1301_v8, 2 }
 0x1ff   : > { %v1482_v49 = vsel %vm1320_vm7, %v3399_v31, %v1342_v13  ;;  %v1498_v9 = vsel %vm1320_vm7, %v1374_v40, %v1372_v60  ;;  %v1417_v24 = vsel %vm1332_vm6, %v1374_v40, %v1416_v30  ;;  %v3414_v1 = vsel %vm1338_vm8, %v1374_v40, %v1457_v35 }
 0x200   : > { %v1209_v44 = vpop.f32.mrf.mxu2  ;;  %v1499_v36 = vsel %vm1323_vm9, %v3244_v22, %v1498_v9  ;;  %v1483_v38 = vsel %vm1323_vm9, %v3236_v0, %v1482_v49  ;;  %v3423_v8 = vsel %vm1320_vm7, %v3405_v18, %v3329_v21  ;;  %v1418_v13 = vsel %vm1335_vm11, %v3244_v22, %v1417_v24 }
 0x201   : > { %v1259_v60 = vadd.f32 %v1209_v44, %v1062_v47  ;;  %v1233_v30 = vpop.f32.mrf.mxu3  ;;  %v1500_v35 = vsel %vm1326_vm5, %v3248_v4, %v1499_v36  ;;  %v1484_v19 = vsel %vm1326_vm5, %v3246_v56, %v1483_v38  ;;  %v3433_v51 = vsel %vm1338_vm8, %v3248_v4, %v1418_v13 }
 0x202   : > { %v1267_v63 = vadd.f32 %v1233_v30, %v1086_v10  ;;  %v1501_v49 = vsel %vm1329_vm10, %v3329_v21, %v1500_v35  ;;  %v1485_v9 = vsel %vm1329_vm10, %v3327_v14, %v1484_v19  ;;  %v3441_v47 = vsel %vm1326_vm5, %v3405_v18, %v1460_v46 }
 0x203   : > { %v1294_v24 = vadd.f32 %v2892_v55, %v1259_v60  ;;  %v3446_v44 = vsel %vm1332_vm6, %v3405_v18, %v1501_v49  ;;  %v3450_v36 = vsel %vm1332_vm6, %v3403_v23, %v1485_v9  ;;  %v3455_v10 = vsel %vm1320_vm7, %v3403_v23, %v3327_v14 }
 0x204   : > { %v1302_v38 = vadd.f32 %v2892_v55, %v1267_v63  ;;  %v3461_v46 = vsel %vm1326_vm5, %v3403_v23, %v3344_v12  ;;  %v1401_v13 = vsel %vm1332_vm6, %v3399_v31, %v3335_v34  ;;  %v1375_v60 = vsel %vm1326_vm5, %v1374_v40, %v3338_v41 }
 0x205   : > { %v1549_v30 = vrot.slane %v1294_v24, 5  ;;  %v1579_v35 = vrot.slane %v1294_v24, 6  ;;  %v1402_v19 = vsel %vm1335_vm11, %v3236_v0, %v1401_v13  ;;  %v1377_v55 = vsel %vm1329_vm10, %v3244_v22, %v1375_v60 }
 0x206   : > { %v1557_v63 = vrot.slane %v1302_v38, 1  ;;  %v1587_v49 = vrot.slane %v1302_v38, 2  ;;  %v3474_v12 = vsel %vm1338_vm8, %v3246_v56, %v1402_v19  ;;  %v1379_v34 = vsel %vm1332_vm6, %v3248_v4, %v1377_v55 }
 0x207   : > { %v1687_v41 = vsel %vm1320_vm7, %v1549_v30, %v3354_v3  ;;  %v1622_v40 = vsel %vm1332_vm6, %v1579_v35, %v1621_v33  ;;  %v1703_v9 = vsel %vm1320_vm7, %v1579_v35, %v3356_v54  ;;  %v1659_v22 = vsel %vm1326_vm5, %v3188_v32, %v1658_v20 }
 0x208   : > { %v1623_v24 = vsel %vm1335_vm11, %v3290_v58, %v1622_v40  ;;  %v1704_v38 = vsel %vm1323_vm9, %v3290_v58, %v1703_v9  ;;  %v1625_v4 = vsel %vm1320_vm7, %v1587_v49, %v3360_v45  ;;  %v1666_v3 = vsel %vm1326_vm5, %v1587_v49, %v3372_v6 }
 0x209   : > { %v1624_v33 = vsel %vm1338_vm8, %v3294_v2, %v1623_v24  ;;  %v1705_v13 = vsel %vm1326_vm5, %v3294_v2, %v1704_v38  ;;  %v1688_v32 = vsel %vm1323_vm9, %v3283_v61, %v1687_v41  ;;  %v3501_v20 = vsel %vm1320_vm7, %v1557_v63, %v3358_v15 }
 0x20a   : > { %1628 = vrot.lane.b32.xlu1 %v1624_v33, %s2199_s4  ;;  %v1706_v60 = vsel %vm1329_vm10, %v3360_v45, %v1705_v13  ;;  %v1689_v6 = vsel %vm1326_vm5, %v3292_v16, %v1688_v32  ;;  %v1606_v19 = vsel %vm1332_vm6, %v1549_v30, %v3368_v17  ;;  %v3512_v55 = vsel %vm1326_vm5, %v1557_v63, %v3376_v42 }
 0x20b   : > { %v1707_v41 = vsel %vm1332_vm6, %v1587_v49, %v1706_v60  ;;  %v1690_v40 = vsel %vm1329_vm10, %v3358_v15, %v1689_v6  ;;  %v1607_v9 = vsel %vm1335_vm11, %v3283_v61, %v1606_v19  ;;  %v3521_v24 = vsel %vm1338_vm8, %v1549_v30, %v3380_v5 }
 0x20c   : > { %1712 = vrot.lane.b32.xlu2 %v1707_v41, %s2199_s4  ;;  %v1691_v17 = vsel %vm1332_vm6, %v1557_v63, %v1690_v40  ;;  %v3527_v42 = vsel %vm1338_vm8, %v3292_v16, %v1607_v9  ;;  %v1580_v38 = vsel %vm1326_vm5, %v1579_v35, %v3364_v29  ;;  %v1381_v33 = vsel %vm1335_vm11, %v3329_v21, %v1379_v34 }
 0x20d   : > { %v1582_v13 = vsel %vm1329_vm10, %v3290_v58, %v1580_v38  ;;  %v3537_v5 = vsel %vm1338_vm8, %v3405_v18, %v1381_v33  ;;  %v3542_v32 = vsel %vm1338_vm8, %v3399_v31, %v3347_v25  ;;  %v1550_v60 = vsel %vm1326_vm5, %v1549_v30, %v3384_v48 }
 0x20e   : > { %v1660_v29 = vsel %vm1329_vm10, %v3262_v7, %v1659_v22  ;;  %v1584_v21 = vsel %vm1332_vm6, %v3294_v2, %v1582_v13  ;;  %v1552_v58 = vsel %vm1329_vm10, %v3283_v61, %v1550_v60  ;;  %v1345_v18 = vsel %vm1326_vm5, %v3399_v31, %v3350_v59 }
 0x20f   : > { %v1661_v25 = vsel %vm1332_vm6, %v3276_v37, %v1660_v29  ;;  %v1586_v34 = vsel %vm1335_vm11, %v3360_v45, %v1584_v21  ;;  %v1554_v48 = vsel %vm1332_vm6, %v3292_v16, %v1552_v58  ;;  %v1347_v7 = vsel %vm1329_vm10, %v3236_v0, %v1345_v18 }
 0x210   : > { %v1662_v2 = vsel %vm1335_vm11, %v3356_v54, %v1661_v25  ;;  %v1588_v61 = vsel %vm1338_vm8, %v1587_v49, %v1586_v34  ;;  %v1556_v59 = vsel %vm1335_vm11, %v3358_v15, %v1554_v48  ;;  %v1349_v37 = vsel %vm1332_vm6, %v3246_v56, %v1347_v7  ;;  %v1709_v56 = vpop.permute.xlu0 %1708 }
 0x211   : > { %v1663_v31 = vsel %vm1338_vm8, %v1579_v35, %v1662_v2  ;;  %v3572_v45 = vsel %vm1338_vm8, %v1557_v63, %v1556_v59  ;;  %v1351_v16 = vsel %vm1335_vm11, %v3327_v14, %v1349_v37  ;;  %v1717_v54 = vsel %vm487_vm2, %v2975_v39, %v1709_v56 }
 0x212   : > { %1669 = vrot.lane.b32.xlu1 %v1663_v31, %s2199_s4  ;;  %v3579_v0 = vsel %vm1338_vm8, %v3403_v23, %v1351_v16  ;;  %v1775_v30 = vrot.slane %v1717_v54, 2 }
 0x214   : > { %1507 = vrot.lane.b32.xlu2 %v3446_v44, %s2199_s4 }
 0x218   : > { %v1504_v63 = vpop.permute.xlu0 %1503 }
 0x219   : > { %v1512_v44 = vsel %vm487_vm2, %v2936_v26, %v1504_v63 }
 0x21c   : > { %1630 = vrot.lane.b32.xlu2 %v1625_v4, %s2199_s4  ;;  %v1739_v4 = vrot.slane %v1512_v44, 2  ;;  %v3734_v44 = vld [vmem:[#allocation5_spill] sm:$0xff] }
 0x220   : > { %v1627_v9 = vpop.permute.xlu0 %1626 }
 0x224   : > { %1671 = vrot.lane.b32.xlu2 %v1666_v3, %s2199_s4 }
 0x258   : > { %v1711_v15 = vpop.permute.xlu1 %1710 }
 0x259   : > { %v1718_v14 = vsel %vm487_vm2, %v3304_v11, %v1711_v15 }
 0x25a   : > { %v1776_v35 = vrot.slane %v1718_v14, 2 }
 0x25c   : > { %v1777_v23 = vsel %vm520_vm1, %v1775_v30, %v1776_v35 }
 0x25d   : > { %1780 = vrot.lane.b32.xlu0 %v1777_v23, %s2200_s5 }
 0x260   : > { %v1506_v49 = vpop.permute.xlu1 %1505 }
 0x261   : > { %v1513_v22 = vsel %vm487_vm2, %v3254_v50, %v1506_v49 }
 0x262   : > { %v1740_v39 = vrot.slane %v1513_v22, 2 }
 0x264   : > { %v1741_v3 = vsel %vm520_vm1, %v1739_v4, %v1740_v39 }
 0x265   : > { %1421 = vrot.lane.b32.xlu0 %v3103_v52, %s2199_s4 }
 0x266   : > { %v1713_v11 = vpop.permute.xlu2 %1712 }
 0x267   : > { %v1719_v6 = vsel %vm487_vm2, %v1691_v17, %v1713_v11 }
 0x268   : > { %v1778_v19 = vrot.slane %v1719_v6, 2 }
 0x26a   : > { %1784 = vrot.lane.b32.xlu2 %v1778_v19, %s2200_s5  ;;  %v1779_v41 = vsel %vm520_vm1, %v1776_v35, %v1778_v19 }
 0x26b   : > { %1782 = vrot.lane.b32.xlu1 %v1779_v41, %s2200_s5 }
 0x26d   : > { %1462 = vrot.lane.b32.xlu0 %v3042_v28, %s2199_s4  ;;  %v1635_v28 = vsel %vm487_vm2, %v3133_v43, %v1627_v9 }
 0x26e   : > { %v1508_v26 = vpop.permute.xlu2 %1507  ;;  %v1759_v38 = vrot.slane %v1635_v28, 2 }
 0x26f   : > { %v1514_v50 = vsel %vm487_vm2, %v3450_v36, %v1508_v26 }
 0x270   : > { %v1742_v40 = vrot.slane %v1514_v50, 2 }
 0x272   : > { %1425 = vrot.lane.b32.xlu2 %v3423_v8, %s2199_s4  ;;  %v1743_v52 = vsel %vm520_vm1, %v1740_v39, %v1742_v40 }
 0x273   : > { %1423 = vrot.lane.b32.xlu1 %v3433_v51, %s2199_s4 }
 0x275   : > { %1744 = vrot.lane.b32.xlu0 %v1741_v3, %s2200_s5 }
 0x276   : > { %v1631_v17 = vpop.permute.xlu2 %1630 }
 0x277   : > { %v1637_v36 = vsel %vm487_vm2, %v3501_v20, %v1631_v17 }
 0x278   : > { %v1762_v33 = vrot.slane %v1637_v36, 2  ;;  %v3735_v36 = vld [vmem:[#allocation7_spill] sm:$0xff] }
 0x27a   : > { %1466 = vrot.lane.b32.xlu2 %v3441_v47, %s2199_s4 }
 0x27b   : > { %1464 = vrot.lane.b32.xlu1 %v3414_v1, %s2199_s4  ;;  %v1668_v1 = vpop.permute.xlu0 %1667 }
 0x27c   : > { %v1629_v8 = vpop.permute.xlu1 %1628  ;;  %v1676_v29 = vsel %vm487_vm2, %v3067_v27, %v1668_v1 }
 0x27d   : > { %v1636_v51 = vsel %vm487_vm2, %v3527_v42, %v1629_v8  ;;  %1589 = vrot.lane.b32.xlu0 %v3195_v57, %s2199_s4 }
 0x27e   : > { %v1760_v13 = vrot.slane %v1636_v51, 2  ;;  %v1672_v57 = vpop.permute.xlu2 %1671 }
 0x27f   : > { %v1678_v21 = vsel %vm487_vm2, %v3512_v55, %v1672_v57 }
 0x280   : > { %v1763_v47 = vsel %vm520_vm1, %v1760_v13, %v1762_v33  ;;  %v1761_v43 = vsel %vm520_vm1, %v1759_v38, %v1760_v13 }
 0x282   : > { %1748 = vrot.lane.b32.xlu2 %v1742_v40, %s2200_s5 }
 0x283   : > { %1746 = vrot.lane.b32.xlu1 %v1743_v52, %s2200_s5 }
 0x284   : > { %v1670_v60 = vpop.permute.xlu1 %1669 }
 0x285   : > { %1766 = vrot.lane.b32.xlu0 %v1763_v47, %s2200_s5  ;;  %v1677_v34 = vsel %vm487_vm2, %v3521_v24, %v1670_v60  ;;  %v3736_v60 = vld [vmem:[#allocation6_spill] sm:$0xff] }
 0x28a   : > { %1764 = vrot.lane.b32.xlu2 %v1761_v43, %s2200_s5 }
 0x28b   : > { %1591 = vrot.lane.b32.xlu1 %v1588_v61, %s2199_s4 }
 0x28d   : > { %1384 = vrot.lane.b32.xlu0 %v3182_v62, %s2199_s4 }
 0x2c4   : > { %v1785_v20 = vpop.permute.xlu2 %1784 }
 0x2c5   : > { %v1791_v58 = vsel %vm697_vm3, %v1678_v21, %v1785_v20 }
 0x2c6   : > { %v1816_v2 = vrot.slane %v1791_v58, 4 }
 0x2cc   : > { %v1426_v18 = vpop.permute.xlu2 %1425 }
 0x2cd   : > { %v1432_v24 = vsel %vm487_vm2, %v3455_v10, %v1426_v18 }
 0x2ce   : > { %v1726_v56 = vrot.slane %v1432_v24, 2 }
 0x2cf   : > { %v1781_v42 = vpop.permute.xlu0 %1780 }
 0x2d0   : > { %v1789_v25 = vsel %vm697_vm3, %v1676_v29, %v1781_v42 }
 0x2d1   : > { %v1813_v61 = vrot.slane %v1789_v25, 4 }
 0x2d4   : > { %v1467_v54 = vpop.permute.xlu2 %1466 }
 0x2d7   : > { %v1422_v62 = vpop.permute.xlu0 %1421 }
 0x2d8   : > { %v1430_v37 = vsel %vm487_vm2, %v3107_v53, %v1422_v62 }
 0x2d9   : > { %v1723_v15 = vrot.slane %v1430_v37, 2 }
 0x2dc   : > { %v1749_v10 = vpop.permute.xlu2 %1748 }
 0x2dd   : > { %v1783_v48 = vpop.permute.xlu1 %1782 }
 0x2de   : > { %v1790_v7 = vsel %vm697_vm3, %v1677_v34, %v1783_v48 }
 0x2df   : > { %v1814_v59 = vrot.slane %v1790_v7, 4  ;;  %v1463_v14 = vpop.permute.xlu0 %1462 }
 0x2e0   : > { %v1471_v49 = vsel %vm487_vm2, %v3734_v44, %v1463_v14 }
 0x2e1   : > { %v1817_v27 = vsel %vm1795_vm12, %v1814_v59, %v1816_v2  ;;  %v1815_v55 = vsel %vm1795_vm12, %v1813_v61, %v1814_v59 }
 0x2e2   : > { %1820 = vrot.lane.b32.xlu2 %v1817_v27, %s2201_s11  ;;  %1818 = vrot.lane.b32.xlu1 %v1815_v55, %s2201_s11 }
 0x2e4   : > { %v1765_v50 = vpop.permute.xlu2 %1764 }
 0x2e5   : > { %v1424_v31 = vpop.permute.xlu1 %1423 }
 0x2e6   : > { %v1431_v16 = vsel %vm487_vm2, %v3474_v12, %v1424_v31  ;;  %v1473_v12 = vsel %vm487_vm2, %v3461_v46, %v1467_v54 }
 0x2e7   : > { %v1724_v30 = vrot.slane %v1431_v16, 2  ;;  %v1745_v23 = vpop.permute.xlu0 %1744  ;;  %v1755_v22 = vsel %vm697_vm3, %v1473_v12, %v1749_v10 }
 0x2e8   : > { %v1753_v4 = vsel %vm697_vm3, %v1471_v49, %v1745_v23  ;;  %v1799_v11 = vrot.slane %v1755_v22, 4 }
 0x2e9   : > { %v1727_v35 = vsel %vm520_vm1, %v1724_v30, %v1726_v56  ;;  %v1725_v63 = vsel %vm520_vm1, %v1723_v15, %v1724_v30  ;;  %v1796_v6 = vrot.slane %v1753_v4, 4 }
 0x2ea   : > { %1386 = vrot.lane.b32.xlu1 %v3537_v5, %s2199_s4  ;;  %1730 = vrot.lane.b32.xlu0 %v1727_v35, %s2200_s5 }
 0x2eb   : > { %1728 = vrot.lane.b32.xlu2 %v1725_v63, %s2200_s5  ;;  %s2202_s5 = smov 64  }
 0x2ed   : > { %v1465_v53 = vpop.permute.xlu1 %1464 }
 0x2ee   : > { %v1472_v5 = vsel %vm487_vm2, %v3542_v32, %v1465_v53 }
 0x2ef   : > { %v1590_v26 = vpop.permute.xlu0 %1589 }
 0x2f0   : > { %v1595_v8 = vsel %vm487_vm2, %v3735_v36, %v1590_v26 }
 0x2f1   : > { %v1770_v33 = vsel %vm697_vm3, %v1595_v8, %v1765_v50 }
 0x2f5   : > { %v1747_v39 = vpop.permute.xlu1 %1746 }
 0x2f6   : > { %v1754_v3 = vsel %vm697_vm3, %v1472_v5, %v1747_v39 }
 0x2f7   : > { %v1797_v19 = vrot.slane %v1754_v3, 4  ;;  %v1767_v52 = vpop.permute.xlu0 %1766 }
 0x2f9   : > { %v1800_v41 = vsel %vm1795_vm12, %v1797_v19, %v1799_v11  ;;  %v1798_v46 = vsel %vm1795_vm12, %v1796_v6, %v1797_v19 }
 0x2fa   : > { %1803 = vrot.lane.b32.xlu2 %v1800_v41, %s2201_s11  ;;  %1801 = vrot.lane.b32.xlu1 %v1798_v46, %s2201_s11 }
 0x2fd   : > { %v1592_v40 = vpop.permute.xlu1 %1591 }
 0x2fe   : > { %v1596_v32 = vsel %vm487_vm2, %v3572_v45, %v1592_v40 }
 0x2ff   : > { %v1771_v17 = vsel %vm697_vm3, %v1596_v32, %v1767_v52  ;;  %v1385_v51 = vpop.permute.xlu0 %1384 }
 0x300   : > { %v1390_v29 = vsel %vm487_vm2, %v3736_v60, %v1385_v51 }
 0x33c   : > { %v1821_v9 = vpop.permute.xlu2 %1820 }
 0x33d   : > { %v1825_v28 = vsel %vm1807_vm13, %v1771_v17, %v1821_v9 }
 0x33e   : > { %1830 = vrot.lane.b32.xlu1 %v1825_v28, %s2202_s5 }
 0x345   : > { %v1729_v45 = vpop.permute.xlu2 %1728 }
 0x346   : > { %v1734_v21 = vsel %vm697_vm3, %v1390_v29, %v1729_v45 }
 0x354   : > { %v1819_v38 = vpop.permute.xlu1 %1818  ;;  %v1804_v1 = vpop.permute.xlu2 %1803 }
 0x355   : > { %v1824_v13 = vsel %vm1807_vm13, %v1770_v33, %v1819_v38 }
 0x356   : > { %1828 = vrot.lane.b32.xlu0 %v1824_v13, %s2202_s5 }
 0x35c   : > { %v1731_v47 = vpop.permute.xlu0 %1730  ;;  %v1387_v43 = vpop.permute.xlu1 %1386 }
 0x35d   : > { %v1391_v57 = vsel %vm487_vm2, %v3579_v0, %v1387_v43 }
 0x35e   : > { %v1735_v20 = vsel %vm697_vm3, %v1391_v57, %v1731_v47 }
 0x35f   : > { %v1809_v42 = vsel %vm1807_vm13, %v1735_v20, %v1804_v1 }
 0x36c   : > { %v1802_v58 = vpop.permute.xlu1 %1801 }
 0x36d   : > { %v1808_v18 = vsel %vm1807_vm13, %v1734_v21, %v1802_v58 }
 0x3b0   : > { %v1831_v25 = vpop.permute.xlu1 %1830 }
 0x3b1   : > { %v1836_v34 = vsel %vm1834_vm14, %v1809_v42, %v1831_v25 }
 0x3b2   : > { %1838 = vst [vmem:[%s187_s21 + $0x8] sm:$0xff] %v1836_v34 }
 0x3c8   : > { %v1829_v0 = vpop.permute.xlu0 %1828 }
 0x3c9   : > { %v1835_v62 = vsel %vm1834_vm14, %v1808_v18, %v1829_v0 }
 0x3ca   : > { %1837 = vst [vmem:[%s187_s21] sm:$0xff] %v1835_v62 }
 0x3cb   : > { %2146 = shalt.err (!%p2143_p5)
}
 0x3cc   : > { %s2203_s18 = smov 128  }
 0x3cd   : > { %2058 = dma.vmem_to_hbm [thread:$0]  (%p2264_p4), %s1855_s29, 256, %s1857_s6, %s1840_s7, %s2203_s18, %s2203_s18, %s2199_s4  }
 0x3ce PF: > { %p2064_p6 = scmp.ge.s32.totalorder %s2197_s17, 2  ;;  %s1871_s19 = sand.u32 1, %s2177_s12  }
 0x3cf   : > { %s1872_s21 = scalar_lea.sflag [#allocation3], %s1871_s19 }
 0x3d0   : > { %p2061_p7 = pnand %p2064_p6, %p2271_p8 }
 0x3d2   : > { %p2062_p9 = pneg %p2061_p7 }
 0x3d4   : > { %2172 = dma.done.wait (%p2062_p9), %s1872_s21, 256  }
 0x3d5   : > { %2174 = vsyncadd (%p2062_p9), %s1872_s21, 4294967040  ;;  %s16_s17 = sadd.s32 1, %s2197_s17   ;;  %s3737_s12 = smov %s2181_s13 }
 0x3d6   : > { %p13_p10 = scmp.ge.s32.totalorder %s16_s17, 4   ;;  %s3738_s13 = smov %s2185_s14 }
 0x3d7   : > { %s3739_s14 = smov %s2277_s25  ;;  %s3740_s15 = smov %s2193_s16 }
 0x3d8   : > { %s3741_s16 = smov %s3743_s20  ;;  %15 = sbr.rel (!%p13_p10) target bundleno = 4 (0x4), region = 67 }
 0x3dd   :  { %1878 = vsyncpa [#allocation3], 1 }
 0x3de   :  { %1880 = vsyncpa [#allocation3 + $0x1], 1 }

</bundles_post_ra>
